<compile_context>
chip_gen: v5e
topology: v5e:2x2
jax: 0.10.0
libtpu: 0.0.40
codegen_flags: <defaults>
</compile_context>

<pallas_src>
import functools

import numpy as np
import jax
import jax.numpy as jnp
from jax.experimental import pallas as pl
from jax.experimental.pallas import tpu as pltpu


# ---------------------------------------------------------------------------
# Generation-aware VMEM budget (v5e/v6e: 128 MiB physical, v7x: 64 MiB)
# ---------------------------------------------------------------------------
def _vmem_limit_bytes():
    try:
        info = pltpu.get_tpu_info()
        cap = getattr(info, "vmem_capacity_bytes", None) or \
              getattr(info, "vmem_size_bytes", None)
        if cap:
            return int(min(cap * 3 // 4, 100 * 1024 * 1024))
    except Exception:
        pass
    return 48 * 1024 * 1024          # safe on every generation


_VMEM_LIMIT = _vmem_limit_bytes()
_MIN_GRID_STEPS = 2                  # keep both v7x TensorCores busy


# ---------------------------------------------------------------------------
# Tiling helpers
# ---------------------------------------------------------------------------
def _pick_tile_rows(n_rows, bytes_per_row, *, budget, min_steps=_MIN_GRID_STEPS,
                    align=32, max_tile=1024):
    """Largest row tile (multiple of `align`, preferably a divisor of n_rows so
    no jnp.pad copy is needed) whose live bytes fit `budget`, keeping
    >= min_steps grid steps when possible."""
    cap = min(max_tile, max(align, budget // max(1, bytes_per_row)))
    cap = max(align, (cap // align) * align)
    for tile in range(cap, align - 1, -align):
        if n_rows % tile == 0 and n_rows // tile >= min_steps:
            return tile
    tile = cap
    while tile > align and pl.cdiv(n_rows, tile) < min_steps:
        tile -= align
    return max(align, tile)


def _pick_tile_windows(n_win_per_image, n_win_total, bytes_per_window, *,
                       budget, min_steps=_MIN_GRID_STEPS):
    """Windows per attention tile: a divisor of nW (so the shift mask maps
    cleanly), as big as fits `budget`, keeping >= min_steps grid steps."""
    divs = [d for d in range(1, n_win_per_image + 1) if n_win_per_image % d == 0]
    fit = [d for d in divs if d * bytes_per_window <= budget] or [1]
    good = [d for d in fit if n_win_total // d >= min_steps]
    return max(good) if good else min(fit)


def _pad_rows(x2, tile):
    rows = x2.shape[0]
    padded = pl.cdiv(rows, tile) * tile
    if padded != rows:
        x2 = jnp.pad(x2, ((0, padded - rows), (0, 0)))
    return x2, rows


# ---------------------------------------------------------------------------
# Swin layout helpers (pure layout; done with XLA outside the kernels)
# ---------------------------------------------------------------------------
def window_partition(x, ws):
    B, H, W, C = x.shape
    x = x.reshape(B, H // ws, ws, W // ws, ws, C)
    return x.transpose(0, 1, 3, 2, 4, 5).reshape(-1, ws, ws, C)


def window_reverse(windows, ws, H, W):
    B = windows.shape[0] // ((H // ws) * (W // ws))
    x = windows.reshape(B, H // ws, W // ws, ws, ws, -1)
    return x.transpose(0, 1, 3, 2, 4, 5).reshape(B, H, W, -1)


def _relative_position_index(ws):
    coords = np.stack(np.meshgrid(np.arange(ws), np.arange(ws), indexing="ij"))
    cf = coords.reshape(2, -1)
    rel = cf[:, :, None] - cf[:, None, :]
    rel = rel.transpose(1, 2, 0).astype(np.int64)
    rel[:, :, 0] += ws - 1
    rel[:, :, 1] += ws - 1
    rel[:, :, 0] *= 2 * ws - 1
    return rel.sum(-1)                                        # (N, N)


def relative_position_bias(table, ws, num_heads):
    idx = _relative_position_index(ws).reshape(-1)
    bias = jnp.asarray(table)[idx].reshape(ws * ws, ws * ws, num_heads)
    return jnp.transpose(bias, (2, 0, 1)).astype(jnp.float32)  # (heads, N, N)


def build_attn_mask(H, W, ws, shift):
    img = np.zeros((1, H, W, 1), np.float32)
    slices = (slice(0, -ws), slice(-ws, -shift), slice(-shift, None))
    cnt = 0
    for hs in slices:
        for wsl in slices:
            img[:, hs, wsl, :] = cnt
            cnt += 1
    mw = img.reshape(1, H // ws, ws, W // ws, ws, 1)
    mw = mw.transpose(0, 1, 3, 2, 4, 5).reshape(-1, ws * ws)
    am = mw[:, None, :] - mw[:, :, None]
    am = np.where(am != 0, -100.0, 0.0).astype(np.float32)
    return jnp.asarray(am)                                    # (nW, N, N)


def _gelu_exact(x):
    # Exact (erf-based) GELU matching torch.nn.GELU(); erf via Abramowitz-Stegun
    # 7.1.26 (|err| < 1.5e-7) so only exp is needed on the EUP.
    z = x * 0.7071067811865476
    az = jnp.abs(z)
    t = 1.0 / (1.0 + 0.3275911 * az)
    poly = ((((1.061405429 * t - 1.453152027) * t + 1.421413741) * t
             - 0.284496736) * t + 0.254829592) * t
    erf_abs = 1.0 - poly * jnp.exp(-az * az)
    erf = jnp.where(z >= 0.0, erf_abs, -erf_abs)
    return 0.5 * x * (1.0 + erf)


# ---------------------------------------------------------------------------
# Stage A kernel: fused LayerNorm + linear (LN affine / q-scale pre-folded)
# ---------------------------------------------------------------------------
def _ln_linear_kernel(x_ref, w_ref, b_ref, o_ref, *, eps):
    x = x_ref[...].astype(jnp.float32)                       # (tile_r, C)
    mu = jnp.mean(x, axis=-1, keepdims=True)
    xc = x - mu
    var = jnp.mean(xc * xc, axis=-1, keepdims=True)          # biased var
    xhat = xc * jax.lax.rsqrt(var + eps)
    o = jnp.dot(xhat.astype(w_ref.dtype), w_ref[...],
                preferred_element_type=jnp.float32) + b_ref[...].astype(jnp.float32)
    o_ref[...] = o.astype(o_ref.dtype)


def ln_linear(x2, w, b, *, eps, out_dtype):
    R, C = x2.shape
    K = w.shape[1]
    ob = jnp.dtype(out_dtype).itemsize
    bytes_per_row = 4 * C + C * x2.dtype.itemsize + (4 + 2 * ob) * K
    tile_r = _pick_tile_rows(R, bytes_per_row, budget=_VMEM_LIMIT // 6)
    xp, rows = _pad_rows(x2, tile_r)
    Rp = xp.shape[0]
    out = pl.pallas_call(
        functools.partial(_ln_linear_kernel, eps=eps),
        out_shape=jax.ShapeDtypeStruct((Rp, K), out_dtype),
        grid=(Rp // tile_r,),
        in_specs=[
            pl.BlockSpec((tile_r, C), lambda i: (i, 0)),
            pl.BlockSpec((C, K), lambda i: (0, 0)),
            pl.BlockSpec((1, K), lambda i: (0, 0)),
        ],
        out_specs=pl.BlockSpec((tile_r, K), lambda i: (i, 0)),
        compiler_params=pltpu.CompilerParams(
            dimension_semantics=("parallel",),
            vmem_limit_bytes=_VMEM_LIMIT),
        cost_estimate=pl.CostEstimate(
            flops=int(2 * Rp * C * K + 8 * Rp * C),
            transcendentals=0,
            bytes_accessed=int(Rp * C * x2.dtype.itemsize + C * K * w.dtype.itemsize
                               + 4 * K + Rp * K * ob)),
    )(xp, w, b)
    return out[:rows] if rows != Rp else out


# ---------------------------------------------------------------------------
# Stage B kernel: windowed multi-head attention with folded output projection.
# Heads are batched into one dot_general (no per-head lane slicing); single
# dense (tile_w, N, C) store per grid step; shift mask (if any) resident.
# ---------------------------------------------------------------------------
def _make_attn_kernel(num_heads, nW, tile_w, has_mask):
    def kernel(q_ref, k_ref, v_ref, bias_ref, wp_ref, bp_ref, *rest):
        if has_mask:
            mask_ref, o_ref = rest
        else:
            (o_ref,) = rest
        f32 = jnp.float32
        tw, nh, N, d = q_ref.shape
        C = nh * d
        q = q_ref[...].reshape(tw * nh, N, d)                 # q carries the 1/sqrt(d)
        k = k_ref[...].reshape(tw * nh, N, d)                 # scale (folded in Stage A)
        s = jnp.einsum("bnd,bmd->bnm", q, k, preferred_element_type=f32)
        s = s.reshape(tw, nh, N, N) + bias_ref[...].astype(f32)[None]
        if has_mask:
            off = (pl.program_id(0) * tile_w) % nW            # tile_w divides nW
            m = mask_ref[pl.ds(off, tile_w)].astype(f32)      # (tw, N, N)
            s = s + m[:, None, :, :]
        s = s - jnp.max(s, axis=-1, keepdims=True)
        e = jnp.exp(s)
        p = e * pl.reciprocal(jnp.sum(e, axis=-1, keepdims=True), approx=True)
        p = p.reshape(tw * nh, N, N).astype(v_ref.dtype)
        v = v_ref[...].reshape(tw * nh, N, d)
        ctx = jnp.einsum("bnm,bmd->bnd", p, v, preferred_element_type=f32)
        ctx = ctx.reshape(tw, nh, N, d)
        # Output projection folded in: out = sum_h ctx_h @ Wp_h + bp.
        # Only the f32 accumulator + one head slab are live per iteration.
        acc = jnp.zeros((tw * N, C), f32)
        for h in range(num_heads):
            ch = ctx[:, h].reshape(tw * N, d).astype(wp_ref.dtype)
            acc = acc + jnp.dot(ch, wp_ref[h], preferred_element_type=f32)
        acc = acc + bp_ref[...].astype(f32)
        o_ref[...] = acc.reshape(tw, N, C).astype(o_ref.dtype)
    return kernel


def window_attention_proj(q, k, v, rel_bias, wp_heads, bp, mask, *, nW, out_dtype):
    BW, nh, N, d = q.shape
    C = nh * d
    ib = q.dtype.itemsize
    ob = jnp.dtype(out_dtype).itemsize
    # per-window live bytes: q/k/v blocks, out + acc, and the f32 score tensors
    bytes_per_window = N * C * (3 * ib + ob + 4) + 4 * nh * N * N * 4
    tile_w = _pick_tile_windows(nW, BW, bytes_per_window, budget=_VMEM_LIMIT // 4)
    has_mask = mask is not None

    kernel = _make_attn_kernel(nh, nW, tile_w, has_mask)
    in_specs = [
        pl.BlockSpec((tile_w, nh, N, d), lambda i: (i, 0, 0, 0)),   # q
        pl.BlockSpec((tile_w, nh, N, d), lambda i: (i, 0, 0, 0)),   # k
        pl.BlockSpec((tile_w, nh, N, d), lambda i: (i, 0, 0, 0)),   # v
        pl.BlockSpec((nh, N, N), lambda i: (0, 0, 0)),              # rel. pos. bias
        pl.BlockSpec((nh, d, C), lambda i: (0, 0, 0)),              # proj weight (heads)
        pl.BlockSpec((1, C), lambda i: (0, 0)),                     # proj bias
    ]
    inputs = [q, k, v, rel_bias, wp_heads, bp]
    if has_mask:
        in_specs.append(pl.BlockSpec((mask.shape[0], N, N), lambda i: (0, 0, 0)))
        inputs.append(mask)

    out = pl.pallas_call(
        kernel,
        out_shape=jax.ShapeDtypeStruct((BW, N, C), out_dtype),
        grid=(BW // tile_w,),
        in_specs=in_specs,
        out_specs=pl.BlockSpec((tile_w, N, C), lambda i: (i, 0, 0)),
        compiler_params=pltpu.CompilerParams(
            dimension_semantics=("parallel",),
            vmem_limit_bytes=_VMEM_LIMIT),
        cost_estimate=pl.CostEstimate(
            flops=int(4 * BW * N * N * C + 2 * BW * N * C * C),
            transcendentals=int(BW * nh * N * N),
            bytes_accessed=int(3 * BW * N * C * ib + BW * N * C * ob
                               + nh * N * N * 4 + nh * d * C * wp_heads.dtype.itemsize
                               + (int(mask.size) * 4 if has_mask else 0))),
    )(*inputs)
    return out


# ---------------------------------------------------------------------------
# Stage C kernel: adapter(Identity) residual + LN2 + MLP + residual
# (LN2 affine pre-folded into fc1 weights/bias)
# ---------------------------------------------------------------------------
def _residual_mlp_kernel(s_ref, c_ref, w1_ref, b1_ref, w2_ref, b2_ref, o_ref, *, eps):
    f32 = jnp.float32
    # adapter == nn.Identity -> perception_attn + memory_attn == 2 * perception_attn
    h = s_ref[...].astype(f32) + 2.0 * c_ref[...].astype(f32)
    mu = jnp.mean(h, axis=-1, keepdims=True)
    hc = h - mu
    var = jnp.mean(hc * hc, axis=-1, keepdims=True)
    xhat = hc * jax.lax.rsqrt(var + eps)
    t = jnp.dot(xhat.astype(w1_ref.dtype), w1_ref[...],
                preferred_element_type=f32) + b1_ref[...].astype(f32)
    t = _gelu_exact(t)
    y = jnp.dot(t.astype(w2_ref.dtype), w2_ref[...],
                preferred_element_type=f32) + b2_ref[...].astype(f32)
    o_ref[...] = (h + y).astype(o_ref.dtype)


def residual_mlp(shortcut2, ctx2, w1, b1, w2, b2, *, eps):
    R, C = shortcut2.shape
    Ch = w1.shape[1]
    # cap tile by live-intermediate size (h/xhat/out: 3C f32, t: Ch f32, inputs)
    bytes_per_row = 4 * (3 * C + Ch) + C * (shortcut2.dtype.itemsize + ctx2.dtype.itemsize)
    tile_r = _pick_tile_rows(R, bytes_per_row, budget=_VMEM_LIMIT // 6)
    sp, rows = _pad_rows(shortcut2, tile_r)
    cp, _ = _pad_rows(ctx2, tile_r)
    Rp = sp.shape[0]
    out = pl.pallas_call(
        functools.partial(_residual_mlp_kernel, eps=eps),
        out_shape=jax.ShapeDtypeStruct((Rp, C), shortcut2.dtype),
        grid=(Rp // tile_r,),
        in_specs=[
            pl.BlockSpec((tile_r, C), lambda i: (i, 0)),
            pl.BlockSpec((tile_r, C), lambda i: (i, 0)),
            pl.BlockSpec((C, Ch), lambda i: (0, 0)),
            pl.BlockSpec((1, Ch), lambda i: (0, 0)),
            pl.BlockSpec((Ch, C), lambda i: (0, 0)),
            pl.BlockSpec((1, C), lambda i: (0, 0)),
        ],
        out_specs=pl.BlockSpec((tile_r, C), lambda i: (i, 0)),
        compiler_params=pltpu.CompilerParams(
            dimension_semantics=("parallel",),
            vmem_limit_bytes=_VMEM_LIMIT),
        cost_estimate=pl.CostEstimate(
            flops=int(4 * Rp * C * Ch + 24 * Rp * C),
            transcendentals=int(Rp * Ch),
            bytes_accessed=int(Rp * C * (8 + ctx2.dtype.itemsize)
                               + 2 * C * Ch * w1.dtype.itemsize + 4 * (C + Ch))),
    )(sp, cp, w1, b1, w2, b2)
    return out[:rows] if rows != Rp else out


# ---------------------------------------------------------------------------
# Full block forward (Pallas path)
# ---------------------------------------------------------------------------
def adapter_swin_block_forward(x, params, *, input_resolution, num_heads,
                               window_size, shift_size, eps=1e-5,
                               compute_dtype=jnp.bfloat16):
    H, W = input_resolution
    B, L, C = x.shape
    assert L == H * W, "input feature has wrong size"
    if min(H, W) <= window_size:
        shift_size = 0
        window_size = min(H, W)
    assert 0 <= shift_size < window_size
    ws = window_size
    N = ws * ws
    nWh, nWw = H // ws, W // ws
    nW = nWh * nWw
    head_dim = C // num_heads
    scale = head_dim ** (-0.5)
    f32 = jnp.float32
    cdt = compute_dtype

    # --- fold LN1 affine and q-scale into the qkv weights --------------------
    g1 = params["norm1_w"].astype(f32)
    t1 = params["norm1_b"].astype(f32)
    wqkv = params["qkv_w"].astype(f32)                        # (C, 3C)
    bqkv = params["qkv_b"].astype(f32)                        # (3C,)
    wqkv_f = g1[:, None] * wqkv
    bqkv_f = t1 @ wqkv + bqkv
    q_scale = jnp.concatenate([jnp.full((C,), scale, f32), jnp.ones((2 * C,), f32)])
    wqkv_f = (wqkv_f * q_scale[None, :]).astype(cdt)
    bqkv_f = (bqkv_f * q_scale)[None, :]                      # (1, 3C) f32

    # --- Stage A: fused norm1 + qkv over all tokens ---------------------------
    qkv_rows = ln_linear(x.reshape(B * L, C), wqkv_f, bqkv_f,
                         eps=eps, out_dtype=cdt)              # (B*L, 3C)

    # --- shift + window partition + head-major split (layout only) -----------
    qkv5 = qkv_rows.reshape(B, H, W, 3, num_heads, head_dim)
    if shift_size > 0:
        qkv5 = jnp.roll(qkv5, (-shift_size, -shift_size), axis=(1, 2))
    qkv_hm = qkv5.reshape(B, nWh, ws, nWw, ws, 3, num_heads, head_dim)
    qkv_hm = qkv_hm.transpose(5, 0, 1, 3, 6, 2, 4, 7)
    qkv_hm = qkv_hm.reshape(3, B * nW, num_heads, N, head_dim)
    q, k, v = qkv_hm[0], qkv_hm[1], qkv_hm[2]                 # (BW, nh, N, d)

    rel_bias = relative_position_bias(params["rpb_table"], ws, num_heads)
    wp_heads = params["proj_w"].astype(f32).reshape(num_heads, head_dim, C).astype(cdt)
    bp = params["proj_b"].astype(f32)[None, :]
    mask = build_attn_mask(H, W, ws, shift_size) if shift_size > 0 else None

    # --- Stage B: windowed multi-head attention + folded output proj ---------
    ctx_win = window_attention_proj(q, k, v, rel_bias, wp_heads, bp, mask,
                                    nW=nW, out_dtype=cdt)     # (BW, N, C)

    # --- window reverse + unshift (layout only) --------------------------------
    ctx4 = window_reverse(ctx_win.reshape(-1, ws, ws, C), ws, H, W)
    if shift_size > 0:
        ctx4 = jnp.roll(ctx4, (shift_size, shift_size), axis=(1, 2))
    ctx_rows = ctx4.reshape(B * L, C)

    # --- fold LN2 affine into fc1 ----------------------------------------------
    g2 = params["norm2_w"].astype(f32)
    t2 = params["norm2_b"].astype(f32)
    w1 = params["fc1_w"].astype(f32)
    b1 = params["fc1_b"].astype(f32)
    w1f = (g2[:, None] * w1).astype(cdt)
    b1f = (t2 @ w1 + b1)[None, :]
    w2c = params["fc2_w"].astype(cdt)
    b2 = params["fc2_b"].astype(f32)[None, :]

    # --- Stage C: residuals + norm2 + MLP --------------------------------------
    out_rows = residual_mlp(x.reshape(B * L, C), ctx_rows, w1f, b1f, w2c, b2, eps=eps)
    return out_rows.reshape(B, L, C)


# ---------------------------------------------------------------------------
# Pure-JAX reference (mirrors the PyTorch forward; no weight folding)
# ---------------------------------------------------------------------------
def _layer_norm_ref(x, g, b, eps):
    mu = jnp.mean(x, axis=-1, keepdims=True)
    var = jnp.mean((x - mu) ** 2, axis=-1, keepdims=True)
    return (x - mu) / jnp.sqrt(var + eps) * g + b


def swin_block_reference(x, params, *, input_resolution, num_heads,
                         window_size, shift_size, eps=1e-5):
    H, W = input_resolution
    B, L, C = x.shape
    if min(H, W) <= window_size:
        shift_size = 0
        window_size = min(H, W)
    ws = window_size
    N = ws * ws
    nW = (H // ws) * (W // ws)
    d = C // num_heads
    scale = d ** (-0.5)

    shortcut = x
    xn = _layer_norm_ref(x, params["norm1_w"], params["norm1_b"], eps)
    x4 = xn.reshape(B, H, W, C)
    if shift_size > 0:
        x4 = jnp.roll(x4, (-shift_size, -shift_size), axis=(1, 2))
    xw = window_partition(x4, ws).reshape(-1, N, C)

    qkv = xw @ params["qkv_w"] + params["qkv_b"]
    qkv = qkv.reshape(-1, N, 3, num_heads, d).transpose(2, 0, 3, 1, 4)
    q, k, v = qkv[0] * scale, qkv[1], qkv[2]
    attn = q @ jnp.swapaxes(k, -2, -1)
    attn = attn + relative_position_bias(params["rpb_table"], ws, num_heads)[None]
    if shift_size > 0:
        mask = build_attn_mask(H, W, ws, shift_size)
        B_ = attn.shape[0]
        attn = attn.reshape(B_ // nW, nW, num_heads, N, N) + mask[None, :, None]
        attn = attn.reshape(B_, num_heads, N, N)
    attn = jax.nn.softmax(attn, axis=-1)
    ctx = (attn @ v).transpose(0, 2, 1, 3).reshape(-1, N, C)
    ctx = ctx @ params["proj_w"] + params["proj_b"]

    x4 = window_reverse(ctx.reshape(-1, ws, ws, C), ws, H, W)
    if shift_size > 0:
        x4 = jnp.roll(x4, (shift_size, shift_size), axis=(1, 2))
    perception = x4.reshape(B, L, C)
    memory = perception                                       # adapter == nn.Identity
    h = shortcut + (perception + memory)

    hn = _layer_norm_ref(h, params["norm2_w"], params["norm2_b"], eps)
    t = jax.nn.gelu(hn @ params["fc1_w"] + params["fc1_b"], approximate=False)
    y = t @ params["fc2_w"] + params["fc2_b"]
    return h + y


# ---------------------------------------------------------------------------
if __name__ == "__main__":
    key = jax.random.PRNGKey(0)
    dim, num_heads = 32, 4
    H = W = 16
    window_size = 8
    B = 2
    L = H * W
    mlp_hidden = int(dim * 4.0)

    ks = jax.random.split(key, 14)

    def rnd(k, shape, s=0.05):
        return s * jax.random.normal(k, shape, dtype=jnp.float32)

    params = {
        "norm1_w": 1.0 + rnd(ks[0], (dim,), 0.1),
        "norm1_b": rnd(ks[1], (dim,), 0.1),
        "qkv_w": rnd(ks[2], (dim, 3 * dim)),
        "qkv_b": rnd(ks[3], (3 * dim,)),
        "proj_w": rnd(ks[4], (dim, dim)),
        "proj_b": rnd(ks[5], (dim,)),
        "rpb_table": rnd(ks[6], ((2 * window_size - 1) ** 2, num_heads), 0.02),
        "norm2_w": 1.0 + rnd(ks[7], (dim,), 0.1),
        "norm2_b": rnd(ks[8], (dim,), 0.1),
        "fc1_w": rnd(ks[9], (dim, mlp_hidden)),
        "fc1_b": rnd(ks[10], (mlp_hidden,)),
        "fc2_w": rnd(ks[11], (mlp_hidden, dim)),
        "fc2_b": rnd(ks[12], (dim,)),
    }
    x = jax.random.normal(ks[13], (B, L, dim), dtype=jnp.float32)

    # Exercise both W-MSA (shift=0) and SW-MSA (shift=window_size//2, masked)
    # paths, each with the f32 (tight check) and bf16 (production) data paths.
    for shift in (0, window_size // 2):
        ref = swin_block_reference(
            x, params, input_resolution=(H, W), num_heads=num_heads,
            window_size=window_size, shift_size=shift)
        for cdt, atol, rtol in ((jnp.float32, 3e-3, 3e-3),
                                (jnp.bfloat16, 8e-2, 5e-2)):
            out = adapter_swin_block_forward(
                x, params, input_resolution=(H, W), num_heads=num_heads,
                window_size=window_size, shift_size=shift, compute_dtype=cdt)
            out = jax.block_until_ready(out)
            assert out.shape == (B, L, dim)
            assert bool(jnp.all(jnp.isfinite(out)))
            err = float(jnp.max(jnp.abs(out - ref)))
            assert jnp.allclose(out, ref, atol=atol, rtol=rtol), \
                f"shift={shift} dtype={cdt} max abs err={err}"

    print("KERNEL_OK")
</pallas_src>

<mosaic_0001>
module attributes {stable_mosaic.version = 11 : i64} {
  func.func @_ln_linear_kernel(%arg0: i32, %arg1: memref<256x32xf32, #tpu.memory_space<vmem>>, %arg2: memref<32x96xf32, #tpu.memory_space<vmem>>, %arg3: memref<1x96xf32, #tpu.memory_space<vmem>>, %arg4: memref<256x96xf32, #tpu.memory_space<vmem>>) attributes {dimension_semantics = [#tpu.dimension_semantics<parallel>], iteration_bounds = array<i64: 2>, scalar_prefetch = 0 : i64, scratch_operands = 0 : i64, tpu.core_type = #tpu.core_type<tc>, window_params = [{transform_indices = @transform_0, window_bounds = array<i64: 256, 32>}, {pipeline_mode = #tpu.pipeline_mode<synchronous>, transform_indices = @transform_1, window_bounds = array<i64: 32, 96>}, {pipeline_mode = #tpu.pipeline_mode<synchronous>, transform_indices = @transform_2, window_bounds = array<i64: 1, 96>}, {transform_indices = @transform_3, window_bounds = array<i64: 256, 96>}]} {
    %c0 = arith.constant 0 : index
    %c0_0 = arith.constant 0 : index
    %0 = vector.load %arg1[%c0, %c0_0] : memref<256x32xf32, #tpu.memory_space<vmem>>, vector<256x32xf32>
    %cst = arith.constant dense<0.000000e+00> : vector<256xf32>
    %1 = vector.multi_reduction <add>, %0, %cst [1] : vector<256x32xf32> to vector<256xf32>
    %2 = vector.shape_cast %1 : vector<256xf32> to vector<256x1xf32>
    %cst_1 = arith.constant 3.200000e+01 : f32
    %3 = vector.broadcast %cst_1 : f32 to vector<256x1xf32>
    %4 = arith.divf %2, %3 : vector<256x1xf32>
    %5 = vector.broadcast %4 : vector<256x1xf32> to vector<256x32xf32>
    %6 = arith.subf %0, %5 : vector<256x32xf32>
    %7 = arith.mulf %6, %6 : vector<256x32xf32>
    %cst_2 = arith.constant dense<0.000000e+00> : vector<256xf32>
    %8 = vector.multi_reduction <add>, %7, %cst_2 [1] : vector<256x32xf32> to vector<256xf32>
    %9 = vector.shape_cast %8 : vector<256xf32> to vector<256x1xf32>
    %cst_3 = arith.constant 3.200000e+01 : f32
    %10 = vector.broadcast %cst_3 : f32 to vector<256x1xf32>
    %11 = arith.divf %9, %10 : vector<256x1xf32>
    %cst_4 = arith.constant 9.99999974E-6 : f32
    %12 = vector.broadcast %cst_4 : f32 to vector<256x1xf32>
    %13 = arith.addf %11, %12 : vector<256x1xf32>
    %14 = math.rsqrt %13 : vector<256x1xf32>
    %15 = vector.broadcast %14 : vector<256x1xf32> to vector<256x32xf32>
    %16 = arith.mulf %6, %15 : vector<256x32xf32>
    %c0_5 = arith.constant 0 : index
    %c0_6 = arith.constant 0 : index
    %17 = vector.load %arg2[%c0_5, %c0_6] : memref<32x96xf32, #tpu.memory_space<vmem>>, vector<32x96xf32>
    %cst_7 = arith.constant dense<0.000000e+00> : vector<256x96xf32>
    %18 = tpu.matmul %16, %17, %cst_7 {dimension_numbers = #tpu.dot_dimension_numbers<[1], [0], [0], [1], [0, 0, 1, 1], [], []>} : vector<256x32xf32>, vector<32x96xf32>, vector<256x96xf32> -> vector<256x96xf32>
    %c0_8 = arith.constant 0 : index
    %c0_9 = arith.constant 0 : index
    %19 = vector.load %arg3[%c0_8, %c0_9] : memref<1x96xf32, #tpu.memory_space<vmem>>, vector<1x96xf32>
    %20 = vector.broadcast %19 : vector<1x96xf32> to vector<256x96xf32>
    %21 = arith.addf %18, %20 : vector<256x96xf32>
    %c0_10 = arith.constant 0 : index
    %c0_11 = arith.constant 0 : index
    %22 = vector.load %arg4[%c0_10, %c0_11] : memref<256x96xf32, #tpu.memory_space<vmem>>, vector<256x96xf32>
    tpu.vector_store %arg4[%c0_10, %c0_11], %21 {strides = array<i32>} : memref<256x96xf32, #tpu.memory_space<vmem>>, vector<256x96xf32>,
    return
  }
  func.func @transform_0(%arg0: i32) -> (i32, i32) {
    %c0_i32 = arith.constant 0 : i32
    %c0_i32_0 = arith.constant 0 : i32
    return %arg0, %c0_i32 : i32, i32
  }
  func.func @transform_1(%arg0: i32) -> (i32, i32) {
    %c0_i32 = arith.constant 0 : i32
    %c0_i32_0 = arith.constant 0 : i32
    %c0_i32_1 = arith.constant 0 : i32
    return %c0_i32, %c0_i32_0 : i32, i32
  }
  func.func @transform_2(%arg0: i32) -> (i32, i32) {
    %c0_i32 = arith.constant 0 : i32
    %c0_i32_0 = arith.constant 0 : i32
    %c0_i32_1 = arith.constant 0 : i32
    return %c0_i32, %c0_i32_0 : i32, i32
  }
  func.func @transform_3(%arg0: i32) -> (i32, i32) {
    %c0_i32 = arith.constant 0 : i32
    %c0_i32_0 = arith.constant 0 : i32
    return %arg0, %c0_i32 : i32, i32
  }
}

</mosaic_0001>

<bundles_post_ra>
// kernel: tpu_custom_call.1
= control target key start
LH: loop header
LB: loop body
LE: loop exit
PB: predicated region body
PF: predicated region fallthrough
CT: control target
= control target key end

     0   :  { %s1384_s12 = smov 0   ;;  %s2609_s0 = inlined_call_operand.vmem [shape: f32[512,32], index: 0, kind: input, shape index: {}]   ;;  %s2610_s1 = inlined_call_operand.vmem [shape: f32[32,96], index: 1, kind: input, shape index: {}]   ;;  %s2611_s2 = inlined_call_operand.vmem [shape: f32[1,96], index: 2, kind: input, shape index: {}]   ;;  %s2612_s3 = inlined_call_operand.vmem [shape: f32[512,96], index: 3, kind: output, shape index: {}]  }
   0x1 LB: > { %s1224_s13 = sadd.s32 4294967295, %s1361_s12   ;;  %p1228_p0 = scmp.ge.s32.totalorder %s1361_s12, 1  ;;  %s1361_s12 = sphi %s1384_s12, %s13_s12  }
   0x2   : > { %p138_p1 = scmp.lt.s32.totalorder %s1361_s12, 3 }
   0x4   : > { %p139_p2 = pnand %p1228_p0, %p138_p1 }
   0x6   : > { %142 = sbr.rel (%p139_p2) target bundleno = 512 (0x200), region = 32 }
   0xb   : > { %s1229_s14 = sshll.u32 %s1224_s13, 5  ;;  %vm206_vm0 = vcmask 261120  }
   0xc   : > { %p163_p3 = scmp.lt.s32.totalorder %s1229_s14, 63 }
   0xe   : > { %s2668_s14 = smov (!%p163_p3, %s1229_s14), 63 }
   0xf   : > { %s1230_s15 = sshll.u32 %s2668_s14, 3 }
  0x10   : > { %s1400_s18 = scalar_lea.vmem %s2609_s0, %s1230_s15  ;;  %s2508_s4 = scalar_lea.vmem %s2612_s3, %s1230_s15 }
  0x11   : > { %v1403_v0 = vld [vmem:[%s1400_s18 + $0x88] sm:$0xff]  ;;  %v1406_v1 = vld [vmem:[%s1400_s18 + $0x80] sm:$0xff]  ;;  %v1433_v12 = vld [vmem:[%s1400_s18 + $0x90] sm:$0xff] }
  0x12   : > { %v1409_v2 = vld [vmem:[%s1400_s18] sm:$0xff]  ;;  %v258_v3 = vsel %vm206_vm0, %v1403_v0, 0.0  ;;  %v255_v4 = vsel %vm206_vm0, %v1406_v1, 0.0  ;;  %v1418_v6 = vld [vmem:[%s1400_s18 + $0xc8] sm:$0xff]  ;;  %v261_v15 = vsel %vm206_vm0, %v1433_v12, 0.0  ;;  %v1448_v18 = vld [vmem:[%s1400_s18 + $0x50] sm:$0xff] }
  0x13   : > { %v207_v5 = vsel %vm206_vm0, %v1409_v2, 0.0  ;;  %259 = vadd.xlane.f32.xlu2 %v258_v3  ;;  %256 = vadd.xlane.f32.xlu0 %v255_v4  ;;  %v1421_v7 = vld [vmem:[%s1400_s18 + $0xc0] sm:$0xff]  ;;  %v282_v9 = vsel %vm206_vm0, %v1418_v6, 0.0  ;;  %v1436_v13 = vld [vmem:[%s1400_s18 + $0x8] sm:$0xff]  ;;  %v1451_v19 = vld [vmem:[%s1400_s18 + $0xd0] sm:$0xff]  ;;  %v237_v21 = vsel %vm206_vm0, %v1448_v18, 0.0 }
  0x14   : > { %208 = vadd.xlane.f32.xlu1 %v207_v5  ;;  %v1424_v8 = vld [vmem:[%s1400_s18 + $0x40] sm:$0xff]  ;;  %v279_v10 = vsel %vm206_vm0, %v1421_v7, 0.0  ;;  %v1439_v14 = vld [vmem:[%s1400_s18 + $0x48] sm:$0xff]  ;;  %v210_v16 = vsel %vm206_vm0, %v1436_v13, 0.0  ;;  %v1454_v20 = vld [vmem:[%s1400_s18 + $0x10] sm:$0xff]  ;;  %v285_v22 = vsel %vm206_vm0, %v1451_v19, 0.0 }
  0x15   : > { %v231_v11 = vsel %vm206_vm0, %v1424_v8, 0.0  ;;  %v234_v17 = vsel %vm206_vm0, %v1439_v14, 0.0  ;;  %v213_v23 = vsel %vm206_vm0, %v1454_v20, 0.0  ;;  %v1463_v24 = vld [vmem:[%s1400_s18 + $0x18] sm:$0xff]  ;;  %v1478_v30 = vld [vmem:[%s1400_s18 + $0xe0] sm:$0xff]  ;;  %v1493_v36 = vld [vmem:[%s1400_s18 + $0xa8] sm:$0xff] }
  0x16   : > { %v1466_v25 = vld [vmem:[%s1400_s18 + $0x98] sm:$0xff]  ;;  %v216_v27 = vsel %vm206_vm0, %v1463_v24, 0.0  ;;  %v1484_v32 = vld [vmem:[%s1400_s18 + $0xa0] sm:$0xff]  ;;  %v291_v33 = vsel %vm206_vm0, %v1478_v30, 0.0  ;;  %v270_v39 = vsel %vm206_vm0, %v1493_v36, 0.0  ;;  %v1508_v42 = vld [vmem:[%s1400_s18 + $0x68] sm:$0xff] }
  0x17   : > { %v1469_v26 = vld [vmem:[%s1400_s18 + $0xd8] sm:$0xff]  ;;  %v264_v28 = vsel %vm206_vm0, %v1466_v25, 0.0  ;;  %v267_v35 = vsel %vm206_vm0, %v1484_v32, 0.0  ;;  %v1496_v37 = vld [vmem:[%s1400_s18 + $0x20] sm:$0xff]  ;;  %v1511_v43 = vld [vmem:[%s1400_s18 + $0xe8] sm:$0xff]  ;;  %v246_v45 = vsel %vm206_vm0, %v1508_v42, 0.0 }
  0x18   : > { %v288_v29 = vsel %vm206_vm0, %v1469_v26, 0.0  ;;  %v1481_v31 = vld [vmem:[%s1400_s18 + $0x58] sm:$0xff]  ;;  %v1499_v38 = vld [vmem:[%s1400_s18 + $0x60] sm:$0xff]  ;;  %v219_v40 = vsel %vm206_vm0, %v1496_v37, 0.0  ;;  %v1514_v44 = vld [vmem:[%s1400_s18 + $0x28] sm:$0xff]  ;;  %v294_v46 = vsel %vm206_vm0, %v1511_v43, 0.0 }
  0x19   : > { %v240_v34 = vsel %vm206_vm0, %v1481_v31, 0.0  ;;  %v243_v41 = vsel %vm206_vm0, %v1499_v38, 0.0  ;;  %v222_v47 = vsel %vm206_vm0, %v1514_v44, 0.0  ;;  %v1523_v48 = vld [vmem:[%s1400_s18 + $0xb0] sm:$0xff]  ;;  %v1538_v54 = vld [vmem:[%s1400_s18 + $0xf8] sm:$0xff]  ;;  %v1363_v3 = vmov 32.0  }
  0x1a   : > { %v1526_v49 = vld [vmem:[%s1400_s18 + $0xf0] sm:$0xff]  ;;  %v273_v51 = vsel %vm206_vm0, %v1523_v48, 0.0  ;;  %v1544_v56 = vld [vmem:[%s1400_s18 + $0xb8] sm:$0xff]  ;;  %v300_v57 = vsel %vm206_vm0, %v1538_v54, 0.0  ;;  %1289 = vrcp.f32 %v1363_v3 }
  0x1b   : > { %283 = vadd.xlane.f32.xlu2 %v282_v9  ;;  %280 = vadd.xlane.f32.xlu0 %v279_v10  ;;  %v1529_v50 = vld [vmem:[%s1400_s18 + $0x70] sm:$0xff]  ;;  %v297_v52 = vsel %vm206_vm0, %v1526_v49, 0.0  ;;  %v276_v59 = vsel %vm206_vm0, %v1544_v56, 0.0  ;;  %v1553_v60 = vld [vmem:[%s1400_s18 + $0x38] sm:$0xff] }
  0x1c   : > { %232 = vadd.xlane.f32.xlu1 %v231_v11  ;;  %v249_v53 = vsel %vm206_vm0, %v1529_v50, 0.0  ;;  %v1541_v55 = vld [vmem:[%s1400_s18 + $0x30] sm:$0xff]  ;;  %v1556_v61 = vld [vmem:[%s1400_s18 + $0x78] sm:$0xff]  ;;  %v228_v62 = vsel %vm206_vm0, %v1553_v60, 0.0 }
  0x1d   : > { %v225_v58 = vsel %vm206_vm0, %v1541_v55, 0.0  ;;  %v252_v63 = vsel %vm206_vm0, %v1556_v61, 0.0 }
  0x20   : > { %v1290_v4 = vpop.eup %1289 }
  0x21   : > { %v304_v5 = vmul.f32 32.0, %v1290_v4  ;;  %vm308_vm1 = vweird.f32 %v1290_v4 }
  0x23   : > { %262 = vadd.xlane.f32.xlu2 %v261_v15  ;;  %211 = vadd.xlane.f32.xlu0 %v210_v16  ;;  %v305_v9 = vsub.f32 1.0, %v304_v5 }
  0x24   : > { %235 = vadd.xlane.f32.xlu1 %v234_v17 }
  0x25   : > { %v306_v10 = vmul.f32 %v1290_v4, %v305_v9 }
  0x27   : > { %v307_v11 = vadd.f32 %v1290_v4, %v306_v10 }
  0x29   : > { %v1562_v15 = vsel %vm308_vm1, %v1290_v4, %v307_v11 }
  0x2b   : > { %238 = vadd.xlane.f32.xlu2 %v237_v21  ;;  %286 = vadd.xlane.f32.xlu0 %v285_v22 }
  0x2c   : > { %214 = vadd.xlane.f32.xlu1 %v213_v23 }
  0x33   : > { %217 = vadd.xlane.f32.xlu2 %v216_v27  ;;  %265 = vadd.xlane.f32.xlu0 %v264_v28 }
  0x34   : > { %289 = vadd.xlane.f32.xlu1 %v288_v29 }
  0x3b   : > { %292 = vadd.xlane.f32.xlu2 %v291_v33  ;;  %241 = vadd.xlane.f32.xlu0 %v240_v34 }
  0x3c   : > { %268 = vadd.xlane.f32.xlu1 %v267_v35 }
  0x43   : > { %271 = vadd.xlane.f32.xlu2 %v270_v39  ;;  %220 = vadd.xlane.f32.xlu0 %v219_v40 }
  0x44   : > { %244 = vadd.xlane.f32.xlu1 %v243_v41 }
  0x4b   : > { %247 = vadd.xlane.f32.xlu2 %v246_v45  ;;  %295 = vadd.xlane.f32.xlu0 %v294_v46 }
  0x4c   : > { %223 = vadd.xlane.f32.xlu1 %v222_v47 }
  0x53   : > { %274 = vadd.xlane.f32.xlu2 %v273_v51  ;;  %298 = vadd.xlane.f32.xlu0 %v297_v52 }
  0x54   : > { %250 = vadd.xlane.f32.xlu1 %v249_v53 }
  0x5b   : > { %301 = vadd.xlane.f32.xlu2 %v300_v57  ;;  %226 = vadd.xlane.f32.xlu0 %v225_v58 }
  0x5c   : > { %277 = vadd.xlane.f32.xlu1 %v276_v59 }
  0x63   : > { %229 = vadd.xlane.f32.xlu2 %v228_v62  ;;  %253 = vadd.xlane.f32.xlu0 %v252_v63 }
  0x86   : > { %v260_v16 = vpop.xlane.xlu2 %259  ;;  %v257_v17 = vpop.xlane.xlu0 %256 }
  0x87   : > { %v326_v21 = vmul.f32 %v1562_v15, %v257_v17  ;;  %v209_v22 = vpop.xlane.xlu1 %208  ;;  %v327_v46 = vmul.f32 %v1562_v15, %v260_v16 }
  0x88   : > { %v310_v41 = vmul.f32 %v1562_v15, %v209_v22 }
  0x89   : > { %v1566_v23 = vsub.f32 %v1406_v1, %v326_v21  ;;  %v1597_v58 = vsub.f32 %v1403_v0, %v327_v46 }
  0x8b   : > { %v390_v27 = vmul.f32 %v1566_v23, %v1566_v23  ;;  %v391_v0 = vmul.f32 %v1597_v58, %v1597_v58 }
  0x8d   : > { %v454_v28 = vsel %vm206_vm0, %v390_v27, 0.0  ;;  %v457_v21 = vsel %vm206_vm0, %v391_v0, 0.0 }
  0x8e   : > { %v284_v29 = vpop.xlane.xlu2 %283  ;;  %v281_v33 = vpop.xlane.xlu0 %280  ;;  %455 = vadd.xlane.f32.xlu0 %v454_v28 }
  0x8f   : > { %v335_v34 = vmul.f32 %v1562_v15, %v284_v29  ;;  %v334_v35 = vmul.f32 %v1562_v15, %v281_v33  ;;  %v233_v39 = vpop.xlane.xlu1 %232 }
  0x90   : > { %v318_v40 = vmul.f32 %v1562_v15, %v233_v39 }
  0x91   : > { %v1576_v1 = vsub.f32 %v1418_v6, %v335_v34  ;;  %v1579_v45 = vsub.f32 %v1421_v7, %v334_v35  ;;  %v1592_v6 = vsub.f32 %v1409_v2, %v310_v41 }
  0x92   : > { %v1583_v47 = vsub.f32 %v1424_v8, %v318_v40 }
  0x93   : > { %v399_v51 = vmul.f32 %v1576_v1, %v1576_v1  ;;  %v398_v52 = vmul.f32 %v1579_v45, %v1579_v45  ;;  %v374_v5 = vmul.f32 %v1592_v6, %v1592_v6 }
  0x94   : > { %v382_v53 = vmul.f32 %v1583_v47, %v1583_v47 }
  0x95   : > { %v481_v7 = vsel %vm206_vm0, %v399_v51, 0.0  ;;  %v478_v57 = vsel %vm206_vm0, %v398_v52, 0.0  ;;  %v406_v16 = vsel %vm206_vm0, %v374_v5, 0.0 }
  0x96   : > { %v263_v8 = vpop.xlane.xlu2 %262  ;;  %482 = vadd.xlane.f32.xlu0 %v481_v7  ;;  %v212_v59 = vpop.xlane.xlu0 %211  ;;  %479 = vadd.xlane.f32.xlu1 %v478_v57  ;;  %v430_v62 = vsel %vm206_vm0, %v382_v53, 0.0 }
  0x97   : > { %v311_v63 = vmul.f32 %v1562_v15, %v212_v59  ;;  %431 = vadd.xlane.f32.xlu2 %v430_v62  ;;  %v236_v3 = vpop.xlane.xlu1 %235  ;;  %v328_v29 = vmul.f32 %v1562_v15, %v263_v8 }
  0x98   : > { %v319_v2 = vmul.f32 %v1562_v15, %v236_v3 }
  0x99   : > { %v1603_v4 = vsub.f32 %v1436_v13, %v311_v63  ;;  %v1634_v41 = vsub.f32 %v1433_v12, %v328_v29 }
  0x9a   : > { %v1610_v9 = vsub.f32 %v1439_v14, %v319_v2 }
  0x9b   : > { %v375_v10 = vmul.f32 %v1603_v4, %v1603_v4  ;;  %v392_v12 = vmul.f32 %v1634_v41, %v1634_v41 }
  0x9c   : > { %v383_v14 = vmul.f32 %v1610_v9, %v1610_v9 }
  0x9d   : > { %v409_v11 = vsel %vm206_vm0, %v375_v10, 0.0 }
  0x9e   : > { %v239_v17 = vpop.xlane.xlu2 %238  ;;  %410 = vadd.xlane.f32.xlu0 %v409_v11  ;;  %v287_v13 = vpop.xlane.xlu0 %286  ;;  %407 = vadd.xlane.f32.xlu1 %v406_v16  ;;  %v433_v39 = vsel %vm206_vm0, %v383_v14, 0.0 }
  0x9f   : > { %v336_v22 = vmul.f32 %v1562_v15, %v287_v13  ;;  %458 = vadd.xlane.f32.xlu2 %v457_v21  ;;  %v215_v27 = vpop.xlane.xlu1 %214  ;;  %v320_v57 = vmul.f32 %v1562_v15, %v239_v17 }
  0xa0   : > { %v312_v28 = vmul.f32 %v1562_v15, %v215_v27 }
  0xa1   : > { %v1623_v33 = vsub.f32 %v1451_v19, %v336_v22  ;;  %v1654_v3 = vsub.f32 %v1448_v18, %v320_v57 }
  0xa2   : > { %v1626_v34 = vsub.f32 %v1454_v20, %v312_v28 }
  0xa3   : > { %v400_v35 = vmul.f32 %v1623_v33, %v1623_v33  ;;  %v384_v13 = vmul.f32 %v1654_v3, %v1654_v3 }
  0xa4   : > { %v376_v40 = vmul.f32 %v1626_v34, %v1626_v34 }
  0xa5   : > { %v484_v46 = vsel %vm206_vm0, %v400_v35, 0.0 }
  0xa6   : > { %v218_v51 = vpop.xlane.xlu2 %217  ;;  %v266_v52 = vpop.xlane.xlu0 %265  ;;  %434 = vadd.xlane.f32.xlu1 %v433_v39  ;;  %v412_v19 = vsel %vm206_vm0, %v376_v40, 0.0 }
  0xa7   : > { %v329_v20 = vmul.f32 %v1562_v15, %v266_v52  ;;  %485 = vadd.xlane.f32.xlu2 %v484_v46  ;;  %413 = vadd.xlane.f32.xlu0 %v412_v19  ;;  %v290_v53 = vpop.xlane.xlu1 %289  ;;  %v313_v17 = vmul.f32 %v1562_v15, %v218_v51 }
  0xa8   : > { %v337_v7 = vmul.f32 %v1562_v15, %v290_v53 }
  0xa9   : > { %v1642_v8 = vsub.f32 %v1466_v25, %v329_v20  ;;  %v460_v25 = vsel %vm206_vm0, %v392_v12, 0.0  ;;  %v1675_v14 = vsub.f32 %v1463_v24, %v313_v17 }
  0xaa   : > { %v1647_v59 = vsub.f32 %v1469_v26, %v337_v7 }
  0xab   : > { %v393_v62 = vmul.f32 %v1642_v8, %v1642_v8  ;;  %v377_v52 = vmul.f32 %v1675_v14, %v1675_v14 }
  0xac   : > { %v401_v63 = vmul.f32 %v1647_v59, %v1647_v59 }
  0xad   : > { %v463_v2 = vsel %vm206_vm0, %v393_v62, 0.0 }
  0xae   : > { %v293_v5 = vpop.xlane.xlu2 %292  ;;  %v242_v0 = vpop.xlane.xlu0 %241  ;;  %461 = vadd.xlane.f32.xlu1 %v460_v25  ;;  %v487_v10 = vsel %vm206_vm0, %v401_v63, 0.0 }
  0xaf   : > { %v321_v26 = vmul.f32 %v1562_v15, %v242_v0  ;;  %464 = vadd.xlane.f32.xlu2 %v463_v2  ;;  %488 = vadd.xlane.f32.xlu0 %v487_v10  ;;  %v269_v11 = vpop.xlane.xlu1 %268  ;;  %v338_v51 = vmul.f32 %v1562_v15, %v293_v5 }
  0xb0   : > { %v330_v16 = vmul.f32 %v1562_v15, %v269_v11 }
  0xb1   : > { %v1663_v18 = vsub.f32 %v1481_v31, %v321_v26  ;;  %v436_v31 = vsel %vm206_vm0, %v384_v13, 0.0  ;;  %v1696_v7 = vsub.f32 %v1478_v30, %v338_v51 }
  0xb2   : > { %v1668_v21 = vsub.f32 %v1484_v32, %v330_v16 }
  0xb3   : > { %v385_v22 = vmul.f32 %v1663_v18, %v1663_v18  ;;  %v402_v0 = vmul.f32 %v1696_v7, %v1696_v7 }
  0xb4   : > { %v394_v27 = vmul.f32 %v1668_v21, %v1668_v21 }
  0xb5   : > { %v439_v28 = vsel %vm206_vm0, %v385_v22, 0.0 }
  0xb6   : > { %v272_v29 = vpop.xlane.xlu2 %271  ;;  %v221_v35 = vpop.xlane.xlu0 %220  ;;  %437 = vadd.xlane.f32.xlu1 %v436_v31  ;;  %v466_v39 = vsel %vm206_vm0, %v394_v27, 0.0 }
  0xb7   : > { %v314_v32 = vmul.f32 %v1562_v15, %v221_v35  ;;  %440 = vadd.xlane.f32.xlu2 %v439_v28  ;;  %467 = vadd.xlane.f32.xlu0 %v466_v39  ;;  %v245_v40 = vpop.xlane.xlu1 %244  ;;  %v331_v5 = vmul.f32 %v1562_v15, %v272_v29 }
  0xb8   : > { %v322_v46 = vmul.f32 %v1562_v15, %v245_v40 }
  0xb9   : > { %v1684_v24 = vsub.f32 %v1496_v37, %v314_v32  ;;  %v415_v37 = vsel %vm206_vm0, %v377_v52, 0.0  ;;  %v1717_v16 = vsub.f32 %v1493_v36, %v331_v5 }
  0xba   : > { %v1689_v19 = vsub.f32 %v1499_v38, %v322_v46 }
  0xbb   : > { %v378_v20 = vmul.f32 %v1684_v24, %v1684_v24  ;;  %v395_v32 = vmul.f32 %v1717_v16, %v1717_v16 }
  0xbc   : > { %v386_v53 = vmul.f32 %v1689_v19, %v1689_v19 }
  0xbd   : > { %v418_v57 = vsel %vm206_vm0, %v378_v20, 0.0 }
  0xbe   : > { %v248_v12 = vpop.xlane.xlu2 %247  ;;  %v296_v62 = vpop.xlane.xlu0 %295  ;;  %416 = vadd.xlane.f32.xlu1 %v415_v37  ;;  %v442_v63 = vsel %vm206_vm0, %v386_v53, 0.0 }
  0xbf   : > { %v339_v38 = vmul.f32 %v1562_v15, %v296_v62  ;;  %419 = vadd.xlane.f32.xlu2 %v418_v57  ;;  %443 = vadd.xlane.f32.xlu0 %v442_v63  ;;  %v224_v2 = vpop.xlane.xlu1 %223  ;;  %v323_v36 = vmul.f32 %v1562_v15, %v248_v12 }
  0xc0   : > { %v315_v25 = vmul.f32 %v1562_v15, %v224_v2 }
  0xc1   : > { %v1705_v30 = vsub.f32 %v1511_v43, %v339_v38  ;;  %v490_v43 = vsel %vm206_vm0, %v402_v0, 0.0  ;;  %v1742_v52 = vsub.f32 %v1508_v42, %v323_v36 }
  0xc2   : > { %v1710_v10 = vsub.f32 %v1514_v44, %v315_v25 }
  0xc3   : > { %v403_v26 = vmul.f32 %v1705_v30, %v1705_v30  ;;  %v387_v62 = vmul.f32 %v1742_v52, %v1742_v52 }
  0xc4   : > { %v379_v11 = vmul.f32 %v1710_v10, %v1710_v10 }
  0xc5   : > { %v493_v17 = vsel %vm206_vm0, %v403_v26, 0.0  ;;  %v445_v5 = vsel %vm206_vm0, %v387_v62, 0.0 }
  0xc6   : > { %v275_v13 = vpop.xlane.xlu2 %274  ;;  %v299_v22 = vpop.xlane.xlu0 %298  ;;  %491 = vadd.xlane.f32.xlu1 %v490_v43  ;;  %v421_v27 = vsel %vm206_vm0, %v379_v11, 0.0 }
  0xc7   : > { %v332_v44 = vmul.f32 %v1562_v15, %v275_v13  ;;  %v340_v28 = vmul.f32 %v1562_v15, %v299_v22  ;;  %494 = vadd.xlane.f32.xlu2 %v493_v17  ;;  %422 = vadd.xlane.f32.xlu0 %v421_v27  ;;  %v251_v31 = vpop.xlane.xlu1 %250 }
  0xc8   : > { %v324_v29 = vmul.f32 %v1562_v15, %v251_v31 }
  0xc9   : > { %v1727_v35 = vsub.f32 %v1523_v48, %v332_v44  ;;  %v1730_v39 = vsub.f32 %v1526_v49, %v340_v28  ;;  %v469_v49 = vsel %vm206_vm0, %v395_v32, 0.0  ;;  %v921_v32 = vld [vmem:[%s2610_s1 + $0x18] sm:$0xff] }
  0xca   : > { %v1739_v51 = vsub.f32 %v1529_v50, %v324_v29  ;;  %1268 = vmatpush.msra.mxu2 %v921_v32  ;;  %1267 = vmatpush.msra.mxu1 %v921_v32 }
  0xcb   : > { %v396_v40 = vmul.f32 %v1727_v35, %v1727_v35  ;;  %v404_v46 = vmul.f32 %v1730_v39, %v1730_v39  ;;  %1269 = vmatpush.msra.mxu3 %v921_v32  ;;  %1034 = vmatpush.msra.mxu0 %v921_v32 }
  0xcc   : > { %v388_v42 = vmul.f32 %v1739_v51, %v1739_v51 }
  0xcd   : > { %v472_v48 = vsel %vm206_vm0, %v396_v40, 0.0  ;;  %v496_v20 = vsel %vm206_vm0, %v404_v46, 0.0  ;;  %v919_v40 = vld [vmem:[%s2610_s1 + $0x8] sm:$0xff]  ;;  %v918_v46 = vld [vmem:[%s2610_s1] sm:$0xff] }
  0xce   : > { %v302_v53 = vpop.xlane.xlu2 %301  ;;  %v227_v57 = vpop.xlane.xlu0 %226  ;;  %470 = vadd.xlane.f32.xlu1 %v469_v49  ;;  %v448_v2 = vsel %vm206_vm0, %v388_v42, 0.0 }
  0xcf   : > { %v316_v37 = vmul.f32 %v1562_v15, %v227_v57  ;;  %473 = vadd.xlane.f32.xlu2 %v472_v48  ;;  %497 = vadd.xlane.f32.xlu0 %v496_v20  ;;  %v278_v12 = vpop.xlane.xlu1 %277  ;;  %v341_v43 = vmul.f32 %v1562_v15, %v302_v53 }
  0xd0   : > { %v333_v50 = vmul.f32 %v1562_v15, %v278_v12 }
  0xd1   : > { %v1757_v38 = vsub.f32 %v1541_v55, %v316_v37  ;;  %v1781_v31 = vsub.f32 %v1538_v54, %v341_v43  ;;  %v920_v54 = vld [vmem:[%s2610_s1 + $0x10] sm:$0xff] }
  0xd2   : > { %v1754_v63 = vsub.f32 %v1544_v56, %v333_v50  ;;  %1271 = vmatpush.msra.mxu2 %v920_v54  ;;  %1270 = vmatpush.msra.mxu1 %v920_v54 }
  0xd3   : > { %v380_v55 = vmul.f32 %v1757_v38, %v1757_v38  ;;  %2620 = vst [vmem:[#allocation5_spill] sm:$0xff] %v1781_v31  ;;  %1272 = vmatpush.msra.mxu3 %v920_v54  ;;  %1035 = vmatpush.msra.mxu0 %v920_v54 }
  0xd4   : > { %2617 = vst [vmem:[#allocation2_spill] sm:$0xff] %v1754_v63  ;;  %v397_v25 = vmul.f32 %v1754_v63, %v1754_v63  ;;  %1274 = vmatpush.msra.mxu2 %v919_v40  ;;  %1273 = vmatpush.msra.mxu1 %v919_v40 }
  0xd5   : > { %v424_v27 = vsel %vm206_vm0, %v380_v55, 0.0  ;;  %1275 = vmatpush.msra.mxu3 %v919_v40  ;;  %1036 = vmatpush.msra.mxu0 %v919_v40 }
  0xd6   : > { %v230_v0 = vpop.xlane.xlu2 %229  ;;  %v254_v26 = vpop.xlane.xlu0 %253  ;;  %446 = vadd.xlane.f32.xlu1 %v445_v5  ;;  %v475_v11 = vsel %vm206_vm0, %v397_v25, 0.0  ;;  %1277 = vmatpush.msra.mxu2 %v918_v46 }
  0xd7   : > { %v317_v17 = vmul.f32 %v1562_v15, %v230_v0  ;;  %v325_v56 = vmul.f32 %v1562_v15, %v254_v26  ;;  %449 = vadd.xlane.f32.xlu2 %v448_v2  ;;  %476 = vadd.xlane.f32.xlu0 %v475_v11 }
  0xd8   : > { %1276 = vmatpush.msra.mxu1 %v918_v46  ;;  %1278 = vmatpush.msra.mxu3 %v918_v46 }
  0xd9   : > { %v1770_v13 = vsub.f32 %v1553_v60, %v317_v17  ;;  %v1773_v22 = vsub.f32 %v1556_v61, %v325_v56  ;;  %v405_v60 = vmul.f32 %v1781_v31, %v1781_v31  ;;  %1037 = vmatpush.msra.mxu0 %v918_v46 }
  0xdb   : > { %2618 = vst [vmem:[#allocation3_spill] sm:$0xff] %v1770_v13  ;;  %v381_v44 = vmul.f32 %v1770_v13, %v1770_v13  ;;  %v389_v28 = vmul.f32 %v1773_v22, %v1773_v22  ;;  %v499_v61 = vsel %vm206_vm0, %v405_v60, 0.0 }
  0xdc   : > { %2619 = vst [vmem:[#allocation4_spill] sm:$0xff] %v1773_v22 }
  0xdd   : > { %v427_v29 = vsel %vm206_vm0, %v381_v44, 0.0  ;;  %v451_v36 = vsel %vm206_vm0, %v389_v28, 0.0 }
  0xde   : > { %425 = vadd.xlane.f32.xlu1 %v424_v27 }
  0xdf   : > { %428 = vadd.xlane.f32.xlu2 %v427_v29  ;;  %452 = vadd.xlane.f32.xlu0 %v451_v36 }
  0xe6   : > { %500 = vadd.xlane.f32.xlu1 %v499_v61 }
 0x101   : > { %v456_v48 = vpop.xlane.xlu0 %455 }
 0x102   : > { %v518_v49 = vmul.f32 %v456_v48, %v1562_v15 }
 0x104   : > { %v550_v20 = vadd.f32 1e-05, %v518_v49 }
 0x106   : > { %1291 = vrsqrt.f32 %v550_v20  ;;  %vm732_vm3 = vweird.f32 %v550_v20 }
 0x109   : > { %v483_v53 = vpop.xlane.xlu0 %482  ;;  %v480_v57 = vpop.xlane.xlu1 %479 }
 0x10a   : > { %v432_v37 = vpop.xlane.xlu2 %431  ;;  %v526_v12 = vmul.f32 %v480_v57, %v1562_v15  ;;  %v527_v50 = vmul.f32 %v483_v53, %v1562_v15 }
 0x10b   : > { %v510_v42 = vmul.f32 %v432_v37, %v1562_v15 }
 0x10c   : > { %v1292_v62 = vpop.eup %1291  ;;  %v1804_v2 = vadd.f32 1e-05, %v526_v12  ;;  %v1808_v26 = vadd.f32 1e-05, %v527_v50 }
 0x10d   : > { %v727_v25 = vmul.f32 %v1292_v62, %v550_v20  ;;  %v1806_v5 = vadd.f32 1e-05, %v510_v42  ;;  %vm733_vm2 = vweird.f32 %v1292_v62 }
 0x10e   : > { %vm734_vm4 = vmor %vm732_vm3, %vm733_vm2  ;;  %vm812_vm9 = vweird.f32 %v1804_v2  ;;  %vm822_vm12 = vweird.f32 %v1808_v26 }
 0x10f   : > { %v728_v0 = vmul.f32 %v1292_v62, %v727_v25  ;;  %1293 = vrsqrt.f32 %v1806_v5  ;;  %vm652_vm5 = vweird.f32 %v1806_v5 }
 0x110   : > { %1295 = vrsqrt.f32 %v1804_v2 }
 0x111   : > { %v729_v11 = vmul.f32 0.5, %v728_v0  ;;  %v411_v17 = vpop.xlane.xlu0 %410  ;;  %v408_v56 = vpop.xlane.xlu1 %407  ;;  %1297 = vrsqrt.f32 %v1808_v26 }
 0x112   : > { %v459_v55 = vpop.xlane.xlu2 %458  ;;  %v502_v43 = vmul.f32 %v408_v56, %v1562_v15  ;;  %v503_v44 = vmul.f32 %v411_v17, %v1562_v15 }
 0x113   : > { %v730_v27 = vsub.f32 1.5, %v729_v11  ;;  %v519_v28 = vmul.f32 %v459_v55, %v1562_v15 }
 0x114   : > { %v1816_v29 = vadd.f32 1e-05, %v502_v43  ;;  %v1828_v46 = vadd.f32 1e-05, %v503_v44 }
 0x115   : > { %v1818_v36 = vpop.eup %1293  ;;  %v1820_v60 = vadd.f32 1e-05, %v519_v28  ;;  %v731_v61 = vmul.f32 %v1292_v62, %v730_v27 }
 0x116   : > { %v1822_v32 = vpop.eup %1295  ;;  %v647_v54 = vmul.f32 %v1818_v36, %v1806_v5  ;;  %vm653_vm6 = vweird.f32 %v1818_v36  ;;  %vm572_vm14 = vweird.f32 %v1816_v29 }
 0x117   : > { %v807_v40 = vmul.f32 %v1822_v32, %v1804_v2  ;;  %1299 = vrsqrt.f32 %v1820_v60  ;;  %v1833_v49 = vpop.eup %1297  ;;  %v735_v37 = vsel %vm734_vm4, %v1292_v62, %v731_v61  ;;  %vm813_vm7 = vweird.f32 %v1822_v32  ;;  %vm1879_vm8 = vmor %vm652_vm5, %vm653_vm6 }
 0x118   : > { %v648_v48 = vmul.f32 %v1818_v36, %v647_v54  ;;  %1301 = vrsqrt.f32 %v1816_v29  ;;  %v902_v25 = vmul.f32 %v735_v37, %v1566_v23  ;;  %v817_v56 = vmul.f32 %v1833_v49, %v1808_v26  ;;  %vm1889_vm10 = vmor %vm812_vm9, %vm813_vm7 }
 0x119   : > { %v808_v53 = vmul.f32 %v1822_v32, %v807_v40  ;;  %v435_v57 = vpop.xlane.xlu1 %434  ;;  %1303 = vrsqrt.f32 %v1828_v46  ;;  %vm823_vm13 = vweird.f32 %v1833_v49  ;;  %vm742_vm3 = vweird.f32 %v1820_v60 }
 0x11a   : > { %v649_v12 = vmul.f32 0.5, %v648_v48  ;;  %v486_v20 = vpop.xlane.xlu2 %485  ;;  %v414_v50 = vpop.xlane.xlu0 %413  ;;  %v511_v42 = vmul.f32 %v435_v57, %v1562_v15  ;;  %1249 = vmatmul.msk.f32.vlgmr.msra.gmra.mxu2 %vm206_vm0, %v902_v25  ;;  %v818_v40 = vmul.f32 %v1833_v49, %v817_v56  ;;  %vm1953_vm2 = vmor %vm822_vm12, %vm823_vm13  ;;  %vm582_vm5 = vweird.f32 %v1828_v46 }
 0x11b   : > { %v809_v0 = vmul.f32 0.5, %v808_v53  ;;  %v528_v11 = vmul.f32 %v486_v20, %v1562_v15  ;;  %v504_v17 = vmul.f32 %v414_v50, %v1562_v15 }
 0x11c   : > { %v1843_v55 = vadd.f32 1e-05, %v511_v42  ;;  %v650_v23 = vsub.f32 1.5, %v649_v12 }
 0x11d   : > { %v1846_v62 = vpop.eup %1299  ;;  %v1848_v43 = vadd.f32 1e-05, %v528_v11  ;;  %v810_v28 = vsub.f32 1.5, %v809_v0  ;;  %v1856_v54 = vadd.f32 1e-05, %v504_v17  ;;  %v819_v17 = vmul.f32 0.5, %v818_v40 }
 0x11e   : > { %v1850_v27 = vpop.eup %1301  ;;  %v737_v44 = vmul.f32 %v1846_v62, %v1820_v60  ;;  %1305 = vrsqrt.f32 %v1843_v55  ;;  %v651_v42 = vmul.f32 %v1818_v36, %v650_v23  ;;  %vm743_vm15 = vweird.f32 %v1846_v62 }
 0x11f   : > { %v567_v61 = vmul.f32 %v1850_v27, %v1816_v29  ;;  %v1860_v48 = vpop.eup %1303  ;;  %1307 = vrsqrt.f32 %v1848_v43  ;;  %v811_v11 = vmul.f32 %v1822_v32, %v810_v28  ;;  %vm573_vm11 = vweird.f32 %v1850_v27  ;;  %vm744_vm4 = vmor %vm742_vm3, %vm743_vm15 }
 0x120   : > { %v738_v53 = vmul.f32 %v1846_v62, %v737_v44  ;;  %1309 = vrsqrt.f32 %v1856_v54  ;;  %v577_v56 = vmul.f32 %v1860_v48, %v1828_v46  ;;  %v655_v2 = vsel %vm1879_vm8, %v1818_v36, %v651_v42  ;;  %vm1934_vm1 = vmor %vm572_vm14, %vm573_vm11 }
 0x121   : > { %v568_v57 = vmul.f32 %v1850_v27, %v567_v61  ;;  %v462_v37 = vpop.xlane.xlu1 %461  ;;  %v894_v42 = vmul.f32 %v655_v2, %v1583_v47  ;;  %vm583_vm6 = vweird.f32 %v1860_v48  ;;  %vm832_vm7 = vweird.f32 %v1848_v43 }
 0x122   : > { %v465_v12 = vpop.xlane.xlu2 %464  ;;  %v489_v20 = vpop.xlane.xlu0 %488  ;;  %v520_v50 = vmul.f32 %v462_v37, %v1562_v15  ;;  %v739_v23 = vmul.f32 0.5, %v738_v53  ;;  %v815_v53 = vsel %vm1889_vm10, %v1822_v32, %v811_v11  ;;  %vm592_vm8 = vweird.f32 %v1856_v54  ;;  %vm2013_vm13 = vmor %vm582_vm5, %vm583_vm6 }
 0x123   : > { %v569_v25 = vmul.f32 0.5, %v568_v57  ;;  %v529_v0 = vmul.f32 %v489_v20, %v1562_v15  ;;  %v521_v57 = vmul.f32 %v465_v12, %v1562_v15  ;;  %v820_v12 = vsub.f32 1.5, %v819_v17  ;;  %1241 = vmatmul.msk.f32.vlgmr.msra.gmra.mxu1 %vm206_vm0, %v894_v42 }
 0x124   : > { %v1875_v44 = vadd.f32 1e-05, %v520_v50  ;;  %v1885_v37 = vpop.eup %1305  ;;  %v578_v50 = vmul.f32 %v1860_v48, %v577_v56  ;;  %v910_v11 = vmul.f32 %v815_v53, %v1579_v45  ;;  %vm662_vm12 = vweird.f32 %v1843_v55 }
 0x125   : > { %v570_v40 = vsub.f32 1.5, %v569_v25  ;;  %v1893_v20 = vadd.f32 1e-05, %v529_v0  ;;  %v1899_v5 = vpop.eup %1307  ;;  %v740_v0 = vsub.f32 1.5, %v739_v23  ;;  %v657_v61 = vmul.f32 %v1885_v37, %v1843_v55 }
 0x126   : > { %1311 = vrsqrt.f32 %v1875_v44  ;;  %v1907_v25 = vpop.eup %1309  ;;  %v1911_v36 = vadd.f32 1e-05, %v521_v57  ;;  %v827_v32 = vmul.f32 %v1899_v5, %v1848_v43  ;;  %v579_v23 = vmul.f32 0.5, %v578_v50  ;;  %1257 = vmatmul.msk.f32.vlgmr.msra.gmra.mxu3 %vm206_vm0, %v910_v11 }
 0x127   : > { %1313 = vrsqrt.f32 %v1893_v20  ;;  %v571_v13 = vmul.f32 %v1850_v27, %v570_v40  ;;  %v587_v45 = vmul.f32 %v1907_v25, %v1856_v54  ;;  %v658_v40 = vmul.f32 %v1885_v37, %v657_v61 }
 0x128   : > { %v821_v53 = vmul.f32 %v1833_v49, %v820_v12  ;;  %v828_v42 = vmul.f32 %v1899_v5, %v827_v32  ;;  %1315 = vrsqrt.f32 %v1911_v36  ;;  %v580_v32 = vsub.f32 1.5, %v579_v23 }
 0x129   : > { %v438_v31 = vpop.xlane.xlu1 %437  ;;  %v575_v11 = vsel %vm1934_vm1, %v1850_v27, %v571_v13  ;;  %v588_v13 = vmul.f32 %v1907_v25, %v587_v45  ;;  %v659_v26 = vmul.f32 0.5, %v658_v40  ;;  %vm663_vm9 = vweird.f32 %v1885_v37 }
 0x12a   : > { %v441_v17 = vpop.xlane.xlu2 %440  ;;  %v468_v56 = vpop.xlane.xlu0 %467  ;;  %v512_v28 = vmul.f32 %v438_v31, %v1562_v15  ;;  %v829_v22 = vmul.f32 0.5, %v828_v42  ;;  %v825_v60 = vsel %vm1953_vm2, %v1833_v49, %v821_v53  ;;  %v581_v61 = vmul.f32 %v1860_v48, %v580_v32  ;;  %vm2025_vm15 = vmor %vm662_vm12, %vm663_vm9 }
 0x12b   : > { %v513_v31 = vmul.f32 %v441_v17, %v1562_v15  ;;  %v522_v2 = vmul.f32 %v468_v56, %v1562_v15  ;;  %v741_v17 = vmul.f32 %v1846_v62, %v740_v0  ;;  %v1990_v53 = vmul.f32 0.5, %v588_v13 }
 0x12c   : > { %v1923_v47 = vpop.eup %1311  ;;  %v1929_v57 = vadd.f32 1e-05, %v512_v28  ;;  %v886_v28 = vmul.f32 %v575_v11, %v1592_v6  ;;  %v830_v11 = vsub.f32 1.5, %v829_v22  ;;  %vm833_vm10 = vweird.f32 %v1899_v5 }
 0x12d   : > { %v1941_v50 = vpop.eup %1313  ;;  %v747_v12 = vmul.f32 %v1923_v47, %v1875_v44  ;;  %v1962_v27 = vadd.f32 1e-05, %v513_v31  ;;  %v1968_v56 = vadd.f32 1e-05, %v522_v2  ;;  %v745_v23 = vsel %vm744_vm4, %v1846_v62, %v741_v17  ;;  %vm834_vm1 = vmor %vm832_vm7, %vm833_vm10 }
 0x12e   : > { %1317 = vrsqrt.f32 %v1929_v57  ;;  %v837_v0 = vmul.f32 %v1941_v50, %v1893_v20  ;;  %1233 = vmatmul.msk.f32.vlgmr.msra.gmra.mxu0 %vm206_vm0, %v886_v28  ;;  %v903_v6 = vmul.f32 %v745_v23, %v1597_v58  ;;  %v911_v2 = vmul.f32 %v825_v60, %v1576_v1  ;;  %v1981_v42 = vpop.eup %1315 }
 0x12f   : > { %v748_v40 = vmul.f32 %v1923_v47, %v747_v12  ;;  %1319 = vrsqrt.f32 %v1962_v27  ;;  %v660_v17 = vsub.f32 1.5, %v659_v26  ;;  %v757_v12 = vmul.f32 %v1981_v42, %v1911_v36 }
 0x130   : > { %v838_v58 = vmul.f32 %v1941_v50, %v837_v0  ;;  %1321 = vrsqrt.f32 %v1968_v56  ;;  %1250 = vmatmul.msk.f32.gmra.mxu2 %vm206_vm0, %v903_v6  ;;  %1258 = vmatmul.msk.f32.gmra.mxu3 %vm206_vm0, %v911_v2  ;;  %vm593_vm11 = vweird.f32 %v1907_v25  ;;  %v590_v26 = vsub.f32 1.5, %v1990_v53 }
 0x131   : > { %v417_v29 = vpop.xlane.xlu1 %416  ;;  %v749_v13 = vmul.f32 0.5, %v748_v40  ;;  %vm842_vm14 = vweird.f32 %v1893_v20  ;;  %v585_v60 = vsel %vm2013_vm13, %v1860_v48, %v581_v61  ;;  %v758_v53 = vmul.f32 %v1981_v42, %v757_v12  ;;  %vm2074_vm3 = vmor %vm592_vm8, %vm593_vm11 }
 0x132   : > { %v420_v45 = vpop.xlane.xlu2 %419  ;;  %v444_v31 = vpop.xlane.xlu0 %443  ;;  %v505_v63 = vmul.f32 %v417_v29, %v1562_v15  ;;  %v839_v0 = vmul.f32 0.5, %v838_v58  ;;  %vm843_vm2 = vweird.f32 %v1941_v50  ;;  %vm753_vm4 = vweird.f32 %v1923_v47 }
 0x133   : > { %v506_v1 = vmul.f32 %v420_v45, %v1562_v15  ;;  %v661_v45 = vmul.f32 %v1885_v37, %v660_v17  ;;  %v750_v58 = vsub.f32 1.5, %v749_v13  ;;  %vm762_vm5 = vweird.f32 %v1911_v36  ;;  %vm2091_vm8 = vmor %vm842_vm14, %vm843_vm2 }
 0x134   : > { %v1986_v49 = vadd.f32 1e-05, %v505_v63  ;;  %v1988_v62 = vpop.eup %1317  ;;  %v514_v63 = vmul.f32 %v444_v31, %v1562_v15  ;;  %v831_v31 = vmul.f32 %v1899_v5, %v830_v11  ;;  %v840_v43 = vsub.f32 1.5, %v839_v0 }
 0x135   : > { %v667_v22 = vmul.f32 %v1988_v62, %v1929_v57  ;;  %v2019_v28 = vadd.f32 1e-05, %v506_v1  ;;  %v2021_v55 = vpop.eup %1319  ;;  %v887_v1 = vmul.f32 %v585_v60, %v1603_v4  ;;  %v665_v11 = vsel %vm2025_vm15, %v1885_v37, %v661_v45 }
 0x136   : > { %1323 = vrsqrt.f32 %v1986_v49  ;;  %v2029_v46 = vadd.f32 1e-05, %v514_v63  ;;  %v2036_v2 = vpop.eup %1321  ;;  %v835_v63 = vsel %vm834_vm1, %v1899_v5, %v831_v31  ;;  %v895_v4 = vmul.f32 %v665_v11, %v1610_v9 }
 0x137   : > { %v668_v17 = vmul.f32 %v1988_v62, %v667_v22  ;;  %1325 = vrsqrt.f32 %v2019_v28  ;;  %1234 = vmatmul.msk.f32.gmra.mxu0 %vm206_vm0, %v887_v1  ;;  %v912_v12 = vmul.f32 %v835_v63, %v1623_v33  ;;  %v677_v13 = vmul.f32 %v2021_v55, %v1962_v27 }
 0x138   : > { %v767_v37 = vmul.f32 %v2036_v2, %v1968_v56  ;;  %1327 = vrsqrt.f32 %v2029_v46  ;;  %v759_v22 = vmul.f32 0.5, %v758_v53  ;;  %1242 = vmatmul.msk.f32.gmra.mxu1 %vm206_vm0, %v895_v4  ;;  %vm763_vm6 = vweird.f32 %v1981_v42 }
 0x139   : > { %v492_v29 = vpop.xlane.xlu1 %491  ;;  %1259 = vmatmul.msk.f32.gmra.mxu3 %vm206_vm0, %v912_v12  ;;  %vm752_vm7 = vweird.f32 %v1875_v44  ;;  %v591_v45 = vmul.f32 %v1907_v25, %v590_v26  ;;  %v751_v53 = vmul.f32 %v1923_v47, %v750_v58  ;;  %v841_v44 = vmul.f32 %v1941_v50, %v840_v43 }
 0x13a   : > { %v495_v40 = vpop.xlane.xlu2 %494  ;;  %v423_v6 = vpop.xlane.xlu0 %422  ;;  %v530_v5 = vmul.f32 %v492_v29, %v1562_v15  ;;  %v669_v29 = vmul.f32 0.5, %v668_v17  ;;  %v760_v17 = vsub.f32 1.5, %v759_v22  ;;  %vm754_vm9 = vmor %vm752_vm7, %vm753_vm4  ;;  %vm772_vm10 = vweird.f32 %v1968_v56 }
 0x13b   : > { %v531_v48 = vmul.f32 %v495_v40, %v1562_v15  ;;  %v507_v61 = vmul.f32 %v423_v6, %v1562_v15  ;;  %v678_v40 = vmul.f32 %v2021_v55, %v677_v13  ;;  %v768_v6 = vmul.f32 %v2036_v2, %v767_v37 }
 0x13c   : > { %v2051_v32 = vpop.eup %1323  ;;  %v2084_v60 = vadd.f32 1e-05, %v530_v5  ;;  %v595_v11 = vsel %vm2074_vm3, %v1907_v25, %v591_v45  ;;  %v670_v58 = vsub.f32 1.5, %v669_v29  ;;  %v755_v43 = vsel %vm754_vm9, %v1923_v47, %v751_v53  ;;  %vm764_vm3 = vmor %vm762_vm5, %vm763_vm6 }
 0x13d   : > { %v597_v0 = vmul.f32 %v2051_v32, %v1986_v49  ;;  %v2068_v9 = vadd.f32 1e-05, %v531_v48  ;;  %v2079_v23 = vadd.f32 1e-05, %v507_v61  ;;  %v2099_v26 = vpop.eup %1325  ;;  %v888_v61 = vmul.f32 %v595_v11, %v1626_v34 }
 0x13e   : > { %v2108_v63 = vpop.eup %1327  ;;  %v904_v4 = vmul.f32 %v755_v43, %v1634_v41  ;;  %v845_v12 = vsel %vm2091_vm8, %v1941_v50, %v841_v44  ;;  %v679_v25 = vmul.f32 0.5, %v678_v40  ;;  %v2119_v37 = vmul.f32 0.5, %v768_v6 }
 0x13f   : > { %v598_v20 = vmul.f32 %v2051_v32, %v597_v0  ;;  %1329 = vrsqrt.f32 %v2068_v9  ;;  %v607_v5 = vmul.f32 %v2099_v26, %v2019_v28  ;;  %1235 = vmatmul.msk.f32.gmra.mxu0 %vm206_vm0, %v888_v61  ;;  %v913_v34 = vmul.f32 %v845_v12, %v1647_v59 }
 0x140   : > { %1331 = vrsqrt.f32 %v2079_v23  ;;  %vm673_vm11 = vweird.f32 %v1988_v62  ;;  %v687_v41 = vmul.f32 %v2108_v63, %v2029_v46  ;;  %1251 = vmatmul.msk.f32.gmra.mxu2 %vm206_vm0, %v904_v4  ;;  %vm672_vm12 = vweird.f32 %v1929_v57 }
 0x141   : > { %v471_v54 = vpop.xlane.xlu1 %470  ;;  %1333 = vrsqrt.f32 %v2084_v60  ;;  %v599_v47 = vmul.f32 0.5, %v598_v20  ;;  %1260 = vmatmul.msk.f32.gmra.mxu3 %vm206_vm0, %v913_v34  ;;  %v671_v0 = vmul.f32 %v1988_v62, %v670_v58  ;;  %vm682_vm13 = vweird.f32 %v1962_v27  ;;  %vm2151_vm2 = vmor %vm672_vm12, %vm673_vm11 }
 0x142   : > { %v474_v1 = vpop.xlane.xlu2 %473  ;;  %v498_v48 = vpop.xlane.xlu0 %497  ;;  %v523_v59 = vmul.f32 %v471_v54, %v1562_v15  ;;  %vm683_vm14 = vweird.f32 %v2021_v55  ;;  %vm773_vm15 = vweird.f32 %v2036_v2  ;;  %vm602_vm1 = vweird.f32 %v1986_v49 }
 0x143   : > { %v524_v13 = vmul.f32 %v474_v1, %v1562_v15  ;;  %v532_v22 = vmul.f32 %v498_v48, %v1562_v15  ;;  %v761_v29 = vmul.f32 %v1981_v42, %v760_v17  ;;  %v680_v40 = vsub.f32 1.5, %v679_v25  ;;  %vm2222_vm8 = vmor %vm772_vm10, %vm773_vm15 }
 0x144   : > { %v770_v54 = vsub.f32 1.5, %v2119_v37  ;;  %v608_v53 = vmul.f32 %v2099_v26, %v607_v5  ;;  %v2156_v44 = vadd.f32 1e-05, %v523_v59  ;;  %v688_v20 = vmul.f32 %v2108_v63, %v687_v41  ;;  %vm684_vm10 = vmor %vm682_vm13, %vm683_vm14 }
 0x145   : > { %v2130_v50 = vadd.f32 1e-05, %v524_v13  ;;  %v2137_v33 = vpop.eup %1329  ;;  %v600_v11 = vsub.f32 1.5, %v599_v47  ;;  %v675_v57 = vsel %vm2151_vm2, %v1988_v62, %v671_v0  ;;  %vm603_vm4 = vweird.f32 %v2051_v32 }
 0x146   : > { %v2144_v31 = vpop.eup %1331  ;;  %v857_v58 = vmul.f32 %v2137_v33, %v2068_v9  ;;  %v2172_v61 = vadd.f32 1e-05, %v532_v22  ;;  %v896_v4 = vmul.f32 %v675_v57, %v1654_v3  ;;  %v765_v62 = vsel %vm764_vm3, %v1981_v42, %v761_v29  ;;  %vm2197_vm7 = vmor %vm602_vm1, %vm603_vm4 }
 0x147   : > { %v2158_v17 = vpop.eup %1333  ;;  %1335 = vrsqrt.f32 %v2130_v50  ;;  %v617_v43 = vmul.f32 %v2144_v31, %v2079_v23  ;;  %v905_v13 = vmul.f32 %v765_v62, %v1642_v8  ;;  %v609_v5 = vmul.f32 0.5, %v608_v53 }
 0x148   : > { %1337 = vrsqrt.f32 %v2156_v44  ;;  %v847_v36 = vmul.f32 %v2158_v17, %v2084_v60  ;;  %vm612_vm5 = vweird.f32 %v2019_v28  ;;  %v2186_v34 = vmul.f32 0.5, %v688_v20  ;;  %1243 = vmatmul.msk.f32.gmra.mxu1 %vm206_vm0, %v896_v4 }
 0x149   : > { %v447_v45 = vpop.xlane.xlu1 %446  ;;  %v601_v42 = vmul.f32 %v2051_v32, %v600_v11  ;;  %vm692_vm6 = vweird.f32 %v2029_v46  ;;  %v858_v41 = vmul.f32 %v2137_v33, %v857_v58  ;;  %1339 = vrsqrt.f32 %v2172_v61  ;;  %1252 = vmatmul.msk.f32.gmra.mxu2 %vm206_vm0, %v905_v13 }
 0x14a   : > { %v450_v1 = vpop.xlane.xlu2 %449  ;;  %v477_v48 = vpop.xlane.xlu0 %476  ;;  %v515_v37 = vmul.f32 %v447_v45, %v1562_v15  ;;  %v681_v22 = vmul.f32 %v2021_v55, %v680_v40  ;;  %v771_v29 = vmul.f32 %v2036_v2, %v770_v54  ;;  %vm613_vm9 = vweird.f32 %v2099_v26 }
 0x14b   : > { %v516_v12 = vmul.f32 %v450_v1, %v1562_v15  ;;  %v525_v25 = vmul.f32 %v477_v48, %v1562_v15  ;;  %v605_v49 = vsel %vm2197_vm7, %v2051_v32, %v601_v42  ;;  %v618_v6 = vmul.f32 %v2144_v31, %v617_v43  ;;  %vm2286_vm2 = vmor %vm612_vm5, %vm613_vm9 }
 0x14c   : > { %v2210_v0 = vadd.f32 1e-05, %v515_v37  ;;  %v848_v53 = vmul.f32 %v2158_v17, %v847_v36  ;;  %v610_v1 = vsub.f32 1.5, %v609_v5  ;;  %vm693_vm11 = vweird.f32 %v2108_v63 }
 0x14d   : > { %v2189_v3 = vadd.f32 1e-05, %v516_v12  ;;  %v2204_v47 = vadd.f32 1e-05, %v525_v25  ;;  %v2207_v59 = vpop.eup %1335  ;;  %v690_v48 = vsub.f32 1.5, %v2186_v34  ;;  %v2239_v20 = vmul.f32 0.5, %v858_v41  ;;  %vm2300_vm5 = vmor %vm692_vm6, %vm693_vm11 }
 0x14e   : > { %v2216_v45 = vpop.eup %1337  ;;  %vm622_vm12 = vweird.f32 %v2079_v23  ;;  %v787_v11 = vmul.f32 %v2207_v59, %v2130_v50  ;;  %v889_v57 = vmul.f32 %v605_v49, %v1675_v14  ;;  %v685_v4 = vsel %vm684_vm10, %v2021_v55, %v681_v22 }
 0x14f   : > { %1341 = vrsqrt.f32 %v2189_v3  ;;  %v777_v56 = vmul.f32 %v2216_v45, %v2156_v44  ;;  %v775_v27 = vsel %vm2222_vm8, %v2036_v2, %v771_v29  ;;  %v2251_v12 = vpop.eup %1339  ;;  %v2253_v36 = vmul.f32 0.5, %v618_v6 }
 0x150   : > { %1343 = vrsqrt.f32 %v2204_v47  ;;  %v849_v13 = vmul.f32 0.5, %v848_v53  ;;  %1236 = vmatmul.msk.f32.gmra.mxu0 %vm206_vm0, %v889_v57  ;;  %v897_v14 = vmul.f32 %v685_v4, %v1663_v18  ;;  %v906_v25 = vmul.f32 %v775_v27, %v1668_v21 }
 0x151   : > { %v426_v54 = vpop.xlane.xlu1 %425  ;;  %1345 = vrsqrt.f32 %v2210_v0  ;;  %v778_v43 = vmul.f32 %v2216_v45, %v777_v56  ;;  %vm623_vm13 = vweird.f32 %v2144_v31  ;;  %vm852_vm14 = vweird.f32 %v2084_v60 }
 0x152   : > { %v429_v32 = vpop.xlane.xlu2 %428  ;;  %v453_v58 = vpop.xlane.xlu0 %452  ;;  %v508_v5 = vmul.f32 %v426_v54, %v1562_v15  ;;  %v860_v42 = vsub.f32 1.5, %v2239_v20  ;;  %vm853_vm15 = vweird.f32 %v2158_v17  ;;  %1244 = vmatmul.msk.f32.gmra.mxu1 %vm206_vm0, %v897_v14  ;;  %1253 = vmatmul.msk.f32.gmra.mxu2 %vm206_vm0, %v906_v25  ;;  %v611_v21 = vmul.f32 %v2099_v26, %v610_v1  ;;  %vm2333_vm11 = vmor %vm622_vm12, %vm623_vm13 }
 0x153   : > { %v509_v62 = vmul.f32 %v429_v32, %v1562_v15  ;;  %v517_v2 = vmul.f32 %v453_v58, %v1562_v15  ;;  %v788_v41 = vmul.f32 %v2207_v59, %v787_v11  ;;  %v867_v22 = vmul.f32 %v2251_v12, %v2172_v61 }
 0x154   : > { %v779_v49 = vmul.f32 0.5, %v778_v43  ;;  %vm782_vm1 = vweird.f32 %v2156_v44  ;;  %vm862_vm3 = vweird.f32 %v2068_v9  ;;  %vm863_vm4 = vweird.f32 %v2137_v33 }
 0x155   : > { %v2258_v37 = vpop.eup %1341  ;;  %v2262_v55 = vadd.f32 1e-05, %v509_v62  ;;  %v620_v40 = vsub.f32 1.5, %v2253_v36  ;;  %v850_v6 = vsub.f32 1.5, %v849_v13  ;;  %vm783_vm7 = vweird.f32 %v2216_v45 }
 0x156   : > { %v2266_v34 = vpop.eup %1343  ;;  %v707_v18 = vmul.f32 %v2258_v37, %v2189_v3  ;;  %vm792_vm8 = vweird.f32 %v2130_v50  ;;  %vm793_vm9 = vweird.f32 %v2207_v59  ;;  %v2308_v54 = vadd.f32 1e-05, %v517_v2  ;;  %vm784_vm12 = vmor %vm782_vm1, %vm783_vm7 }
 0x157   : > { %v2275_v8 = vpop.eup %1345  ;;  %1347 = vrsqrt.f32 %v2262_v55  ;;  %v797_v32 = vmul.f32 %v2266_v34, %v2204_v47  ;;  %v2310_v1 = vadd.f32 1e-05, %v508_v5  ;;  %v615_v56 = vsel %vm2286_vm2, %v2099_v26, %v611_v21  ;;  %vm854_vm2 = vmor %vm852_vm14, %vm853_vm15 }
 0x158   : > { %v697_v53 = vmul.f32 %v2275_v8, %v2210_v0  ;;  %v708_v46 = vmul.f32 %v2258_v37, %v707_v18  ;;  %v890_v57 = vmul.f32 %v615_v56, %v1684_v24  ;;  %v691_v58 = vmul.f32 %v2108_v63, %v690_v48  ;;  %vm2389_vm14 = vmor %vm862_vm3, %vm863_vm4 }
 0x159   : > { %v501_v43 = vpop.xlane.xlu1 %500  ;;  %v789_v4 = vmul.f32 0.5, %v788_v41  ;;  %v868_v27 = vmul.f32 %v2251_v12, %v867_v22  ;;  %v780_v62 = vsub.f32 1.5, %v779_v49  ;;  %1349 = vrsqrt.f32 %v2308_v54  ;;  %vm2403_vm15 = vmor %vm792_vm8, %vm793_vm9 }
 0x15a   : > { %v698_v11 = vmul.f32 %v2275_v8, %v697_v53  ;;  %vm702_vm6 = vweird.f32 %v2210_v0  ;;  %1351 = vrsqrt.f32 %v2310_v1  ;;  %1237 = vmatmul.msk.f32.gmra.mxu0 %vm206_vm0, %v890_v57  ;;  %v695_v24 = vsel %vm2300_vm5, %v2108_v63, %v691_v58 }
 0x15b   : > { %vm703_vm10 = vweird.f32 %v2275_v8  ;;  %v898_v13 = vmul.f32 %v695_v24, %v1689_v19  ;;  %v851_v14 = vmul.f32 %v2158_v17, %v850_v6  ;;  %v533_v25 = vmul.f32 %v501_v43, %v1562_v15 }
 0x15c   : > { %v699_v36 = vmul.f32 0.5, %v698_v11  ;;  %v709_v63 = vmul.f32 0.5, %v708_v46  ;;  %v798_v23 = vmul.f32 %v2266_v34, %v797_v32  ;;  %v621_v5 = vmul.f32 %v2144_v31, %v620_v40  ;;  %vm2376_vm13 = vmor %vm702_vm6, %vm703_vm10 }
 0x15d   : > { %v2327_v26 = vpop.eup %1347  ;;  %1245 = vmatmul.msk.f32.gmra.mxu1 %vm206_vm0, %v898_v13  ;;  %v855_v19 = vsel %vm854_vm2, %v2158_v17, %v851_v14  ;;  %v2351_v21 = vadd.f32 1e-05, %v533_v25  ;;  %v781_v15 = vmul.f32 %v2216_v45, %v780_v62  ;;  %v790_v41 = vsub.f32 1.5, %v789_v4 }
 0x15e   : > { %v700_v2 = vsub.f32 1.5, %v699_v36  ;;  %v637_v18 = vmul.f32 %v2327_v26, %v2262_v55  ;;  %v914_v60 = vmul.f32 %v855_v19, %v1696_v7  ;;  %v625_v22 = vsel %vm2333_vm11, %v2144_v31, %v621_v5 }
 0x15f   : > { %v2363_v29 = vpop.eup %1349  ;;  %v869_v17 = vmul.f32 0.5, %v868_v27  ;;  %1353 = vrsqrt.f32 %v2351_v21  ;;  %v785_v40 = vsel %vm784_vm12, %v2216_v45, %v781_v15  ;;  %v861_v44 = vmul.f32 %v2137_v33, %v860_v42 }
 0x160   : > { %v701_v49 = vmul.f32 %v2275_v8, %v700_v2  ;;  %v2370_v6 = vpop.eup %1351  ;;  %v710_v7 = vsub.f32 1.5, %v709_v63  ;;  %v717_v53 = vmul.f32 %v2363_v29, %v2308_v54  ;;  %1261 = vmatmul.msk.f32.gmra.mxu3 %vm206_vm0, %v914_v60  ;;  %v891_v45 = vmul.f32 %v625_v22, %v1710_v10 }
 0x161   : > { %v907_v20 = vmul.f32 %v785_v40, %v1717_v16  ;;  %v799_v0 = vmul.f32 0.5, %v798_v23  ;;  %v638_v28 = vmul.f32 %v2327_v26, %v637_v18  ;;  %v627_v32 = vmul.f32 %v2370_v6, %v2310_v1 }
 0x162   : > { %v705_v10 = vsel %vm2376_vm13, %v2275_v8, %v701_v49  ;;  %vm872_vm1 = vweird.f32 %v2172_v61  ;;  %vm712_vm3 = vweird.f32 %v2189_v3  ;;  %v718_v9 = vmul.f32 %v2363_v29, %v717_v53  ;;  %1238 = vmatmul.msk.f32.gmra.mxu0 %vm206_vm0, %v891_v45 }
 0x163   : > { %1254 = vmatmul.msk.f32.gmra.mxu2 %vm206_vm0, %v907_v20  ;;  %v899_v8 = vmul.f32 %v705_v10, %v1742_v52  ;;  %v870_v56 = vsub.f32 1.5, %v869_v17  ;;  %v628_v46 = vmul.f32 %v2370_v6, %v627_v32  ;;  %v865_v50 = vsel %vm2389_vm14, %v2137_v33, %v861_v44  ;;  %v2665_v17 = vld [vmem:[#allocation3_spill] sm:$0xff]  ;;  %v2666_v44 = vld [vmem:[#allocation5_spill] sm:$0xff] }
 0x164   : > { %v791_v11 = vmul.f32 %v2207_v59, %v790_v41  ;;  %vm873_vm4 = vweird.f32 %v2251_v12  ;;  %vm713_vm7 = vweird.f32 %v2258_v37  ;;  %v719_v57 = vmul.f32 0.5, %v718_v9  ;;  %v2663_v41 = vld [vmem:[#allocation2_spill] sm:$0xff] }
 0x165   : > { %v711_v58 = vmul.f32 %v2258_v37, %v710_v7  ;;  %v1354_v43 = vpop.eup %1353  ;;  %v800_v4 = vsub.f32 1.5, %v799_v0  ;;  %v639_v27 = vmul.f32 0.5, %v638_v28  ;;  %v629_v52 = vmul.f32 0.5, %v628_v46  ;;  %1246 = vmatmul.msk.f32.gmra.mxu1 %vm206_vm0, %v899_v8  ;;  %vm2431_vm9 = vmor %vm712_vm3, %vm713_vm7 }
 0x166   : > { %v795_v62 = vsel %vm2403_vm15, %v2207_v59, %v791_v11  ;;  %vm802_vm5 = vweird.f32 %v2204_v47  ;;  %vm803_vm8 = vweird.f32 %v2266_v34  ;;  %v877_v33 = vmul.f32 %v1354_v43, %v2351_v21  ;;  %vm2441_vm11 = vmor %vm872_vm1, %vm873_vm4 }
 0x167   : > { %v915_v36 = vmul.f32 %v865_v50, %v1705_v30  ;;  %v630_v48 = vsub.f32 1.5, %v629_v52  ;;  %vm633_vm6 = vweird.f32 %v2370_v6  ;;  %v871_v13 = vmul.f32 %v2251_v12, %v870_v56  ;;  %vm2450_vm10 = vmor %vm802_vm5, %vm803_vm8 }
 0x168   : > { %v720_v30 = vsub.f32 1.5, %v719_v57  ;;  %v878_v59 = vmul.f32 %v1354_v43, %v877_v33  ;;  %v908_v3 = vmul.f32 %v795_v62, %v1727_v35  ;;  %v715_v14 = vsel %vm2431_vm9, %v2258_v37, %v711_v58 }
 0x169   : > { %1262 = vmatmul.msk.f32.gmra.mxu3 %vm206_vm0, %v915_v36  ;;  %v640_v63 = vsub.f32 1.5, %v639_v27  ;;  %vm632_vm2 = vweird.f32 %v2310_v1  ;;  %v631_v61 = vmul.f32 %v2370_v6, %v630_v48  ;;  %v801_v23 = vmul.f32 %v2266_v34, %v800_v4 }
 0x16a   : > { %vm642_vm12 = vweird.f32 %v2262_v55  ;;  %vm722_vm13 = vweird.f32 %v2308_v54  ;;  %vm723_vm14 = vweird.f32 %v2363_v29  ;;  %vm634_vm15 = vmor %vm632_vm2, %vm633_vm6  ;;  %v879_v35 = vmul.f32 0.5, %v878_v59 }
 0x16b   : > { %1255 = vmatmul.msk.f32.gmra.mxu2 %vm206_vm0, %v908_v3  ;;  %vm643_vm1 = vweird.f32 %v2327_v26  ;;  %v875_v37 = vsel %vm2441_vm11, %v2251_v12, %v871_v13  ;;  %v635_v1 = vsel %vm634_vm15, %v2370_v6, %v631_v61  ;;  %v900_v2 = vmul.f32 %v715_v14, %v1739_v51  ;;  %vm2471_vm3 = vmor %vm722_vm13, %vm723_vm14 }
 0x16c   : > { %v880_v5 = vsub.f32 1.5, %v879_v35  ;;  %v892_v54 = vmul.f32 %v635_v1, %v1757_v38  ;;  %v721_v18 = vmul.f32 %v2363_v29, %v720_v30  ;;  %vm883_vm4 = vweird.f32 %v1354_v43  ;;  %vm644_vm7 = vmor %vm642_vm12, %vm643_vm1 }
 0x16d   : > { %1247 = vmatmul.msk.f32.gmra.mxu1 %vm206_vm0, %v900_v2  ;;  %v805_v12 = vsel %vm2450_vm10, %v2266_v34, %v801_v23  ;;  %v641_v15 = vmul.f32 %v2327_v26, %v640_v63  ;;  %v916_v51 = vmul.f32 %v875_v37, %v1730_v39  ;;  %vm882_vm5 = vweird.f32 %v2351_v21  ;;  %v2664_v39 = vld [vmem:[#allocation4_spill] sm:$0xff] }
 0x16e   : > { %1239 = vmatmul.msk.f32.gmra.mxu0 %vm206_vm0, %v892_v54  ;;  %v881_v38 = vmul.f32 %v1354_v43, %v880_v5  ;;  %vm884_vm8 = vmor %vm882_vm5, %vm883_vm4  ;;  %v909_v60 = vmul.f32 %v805_v12, %v2663_v41  ;;  %v725_v34 = vsel %vm2471_vm3, %v2363_v29, %v721_v18  ;;  %v2501_v29 = vld [vmem:[%s2611_s2] ss:$0 sm:$0xff]  ;;  %vm1135_vm9 = vcmask 785408  }
 0x16f   : > { %v645_v55 = vsel %vm644_vm7, %v2327_v26, %v641_v15  ;;  %v901_v49 = vmul.f32 %v725_v34, %v2664_v39 }
 0x170   : > { %v885_v22 = vsel %vm884_vm8, %v1354_v43, %v881_v38  ;;  %v893_v40 = vmul.f32 %v645_v55, %v2665_v17 }
 0x171   : > { %1263 = vmatmul.msk.f32.gmra.mxu3 %vm206_vm0, %v916_v51  ;;  %v917_v21 = vmul.f32 %v885_v22, %v2666_v44 }
 0x173   : > { %1256 = vmatmul.msk.f32.gmra.mxu2 %vm206_vm0, %v909_v60 }
 0x175   : > { %1248 = vmatmul.msk.f32.gmra.mxu1 %vm206_vm0, %v901_v49 }
 0x176   : > { %1240 = vmatmul.msk.f32.gmra.mxu0 %vm206_vm0, %v893_v40 }
 0x179   : > { %1264 = vmatmul.msk.f32.gmra.mxu3 %vm206_vm0, %v917_v21 }
 0x19d   : > { %v1087_v26 = vpop.f32.mrf.mxu2 }
 0x19e   : > { %v1088_v6 = vadd.f32 %v2501_v29, %v1087_v26 }
 0x1a0   : > { %1152 = vst.msk [vmem:[%s2508_s4 + $0x80] sm:$0xff] %vm1135_vm9, %v1088_v6  ;;  %v1063_v7 = vpop.f32.mrf.mxu1 }
 0x1a1   : > { %v1064_v31 = vadd.f32 %v2501_v29, %v1063_v7 }
 0x1a3   : > { %1144 = vst.msk [vmem:[%s2508_s4 + $0x40] sm:$0xff] %vm1135_vm9, %v1064_v31 }
 0x1a9   : > { %v1111_v53 = vpop.f32.mrf.mxu3 }
 0x1aa   : > { %v1112_v45 = vadd.f32 %v2501_v29, %v1111_v53 }
 0x1ab   : > { %v1039_v20 = vpop.f32.mrf.mxu0 }
 0x1ac   : > { %v1040_v42 = vadd.f32 %v2501_v29, %v1039_v20  ;;  %1160 = vst.msk [vmem:[%s2508_s4 + $0xc0] sm:$0xff] %vm1135_vm9, %v1112_v45 }
 0x1ae   : > { %1136 = vst.msk [vmem:[%s2508_s4] sm:$0xff] %vm1135_vm9, %v1040_v42 }
 0x1b3   : > { %v1090_v0 = vpop.f32.mrf.mxu2  ;;  %v1114_v28 = vpop.f32.mrf.mxu3 }
 0x1b4   : > { %v1091_v32 = vadd.f32 %v2501_v29, %v1090_v0  ;;  %v1115_v10 = vadd.f32 %v2501_v29, %v1114_v28  ;;  %v1042_v16 = vpop.f32.mrf.mxu0 }
 0x1b5   : > { %v1043_v9 = vadd.f32 %v2501_v29, %v1042_v16  ;;  %v1066_v8 = vpop.f32.mrf.mxu1 }
 0x1b6   : > { %1153 = vst.msk [vmem:[%s2508_s4 + $0x88] sm:$0xff] %vm1135_vm9, %v1091_v32  ;;  %v1067_v56 = vadd.f32 %v2501_v29, %v1066_v8 }
 0x1b7   : > { %1161 = vst.msk [vmem:[%s2508_s4 + $0xc8] sm:$0xff] %vm1135_vm9, %v1115_v10 }
 0x1b8   : > { %1137 = vst.msk [vmem:[%s2508_s4 + $0x8] sm:$0xff] %vm1135_vm9, %v1043_v9 }
 0x1b9   : > { %1145 = vst.msk [vmem:[%s2508_s4 + $0x48] sm:$0xff] %vm1135_vm9, %v1067_v56 }
 0x1bc   : > { %v1117_v46 = vpop.f32.mrf.mxu3  ;;  %v1045_v11 = vpop.f32.mrf.mxu0 }
 0x1bd   : > { %v1118_v50 = vadd.f32 %v2501_v29, %v1117_v46  ;;  %v1046_v57 = vadd.f32 %v2501_v29, %v1045_v11 }
 0x1bf   : > { %1162 = vst.msk [vmem:[%s2508_s4 + $0xd0] sm:$0xff] %vm1135_vm9, %v1118_v50 }
 0x1c0   : > { %1138 = vst.msk [vmem:[%s2508_s4 + $0x10] sm:$0xff] %vm1135_vm9, %v1046_v57 }
 0x1c3   : > { %v1093_v58 = vpop.f32.mrf.mxu2 }
 0x1c4   : > { %v1094_v43 = vadd.f32 %v2501_v29, %v1093_v58  ;;  %v1120_v4 = vpop.f32.mrf.mxu3 }
 0x1c5   : > { %v1121_v27 = vadd.f32 %v2501_v29, %v1120_v4  ;;  %v1069_v52 = vpop.f32.mrf.mxu1 }
 0x1c6   : > { %1154 = vst.msk [vmem:[%s2508_s4 + $0x90] sm:$0xff] %vm1135_vm9, %v1094_v43  ;;  %v1070_v62 = vadd.f32 %v2501_v29, %v1069_v52 }
 0x1c7   : > { %1163 = vst.msk [vmem:[%s2508_s4 + $0xd8] sm:$0xff] %vm1135_vm9, %v1121_v27 }
 0x1c8   : > { %1146 = vst.msk [vmem:[%s2508_s4 + $0x50] sm:$0xff] %vm1135_vm9, %v1070_v62 }
 0x1cc   : > { %v1096_v33 = vpop.f32.mrf.mxu2 }
 0x1cd   : > { %v1048_v36 = vpop.f32.mrf.mxu0  ;;  %v1097_v24 = vadd.f32 %v2501_v29, %v1096_v33 }
 0x1ce   : > { %v1049_v48 = vadd.f32 %v2501_v29, %v1048_v36 }
 0x1cf   : > { %v1072_v13 = vpop.f32.mrf.mxu1  ;;  %1155 = vst.msk [vmem:[%s2508_s4 + $0x98] sm:$0xff] %vm1135_vm9, %v1097_v24 }
 0x1d0   : > { %v1073_v47 = vadd.f32 %v2501_v29, %v1072_v13  ;;  %1139 = vst.msk [vmem:[%s2508_s4 + $0x18] sm:$0xff] %vm1135_vm9, %v1049_v48 }
 0x1d2   : > { %1147 = vst.msk [vmem:[%s2508_s4 + $0x58] sm:$0xff] %vm1135_vm9, %v1073_v47 }
 0x1d5   : > { %v1099_v30 = vpop.f32.mrf.mxu2 }
 0x1d6   : > { %v1100_v3 = vadd.f32 %v2501_v29, %v1099_v30 }
 0x1d7   : > { %v1051_v59 = vpop.f32.mrf.mxu0 }
 0x1d8   : > { %v1052_v14 = vadd.f32 %v2501_v29, %v1051_v59  ;;  %1156 = vst.msk [vmem:[%s2508_s4 + $0xa0] sm:$0xff] %vm1135_vm9, %v1100_v3 }
 0x1da   : > { %v1075_v25 = vpop.f32.mrf.mxu1  ;;  %1140 = vst.msk [vmem:[%s2508_s4 + $0x20] sm:$0xff] %vm1135_vm9, %v1052_v14 }
 0x1db   : > { %v1076_v63 = vadd.f32 %v2501_v29, %v1075_v25 }
 0x1dd   : > { %1148 = vst.msk [vmem:[%s2508_s4 + $0x60] sm:$0xff] %vm1135_vm9, %v1076_v63 }
 0x1df   : > { %v1054_v61 = vpop.f32.mrf.mxu0 }
 0x1e0   : > { %v1055_v23 = vadd.f32 %v2501_v29, %v1054_v61 }
 0x1e2   : > { %1141 = vst.msk [vmem:[%s2508_s4 + $0x28] sm:$0xff] %vm1135_vm9, %v1055_v23  ;;  %v1078_v35 = vpop.f32.mrf.mxu1 }
 0x1e3   : > { %v1123_v37 = vpop.f32.mrf.mxu3  ;;  %v1079_v1 = vadd.f32 %v2501_v29, %v1078_v35 }
 0x1e4   : > { %v1124_v2 = vadd.f32 %v2501_v29, %v1123_v37 }
 0x1e5   : > { %1149 = vst.msk [vmem:[%s2508_s4 + $0x68] sm:$0xff] %vm1135_vm9, %v1079_v1 }
 0x1e6   : > { %v1102_v5 = vpop.f32.mrf.mxu2  ;;  %1164 = vst.msk [vmem:[%s2508_s4 + $0xe0] sm:$0xff] %vm1135_vm9, %v1124_v2 }
 0x1e7   : > { %v1103_v54 = vadd.f32 %v2501_v29, %v1102_v5 }
 0x1e9   : > { %1157 = vst.msk [vmem:[%s2508_s4 + $0xa8] sm:$0xff] %vm1135_vm9, %v1103_v54 }
 0x1ea   : > { %v1081_v18 = vpop.f32.mrf.mxu1 }
 0x1eb   : > { %v1057_v12 = vpop.f32.mrf.mxu0  ;;  %v1082_v15 = vadd.f32 %v2501_v29, %v1081_v18 }
 0x1ec   : > { %v1126_v19 = vpop.f32.mrf.mxu3  ;;  %v1058_v38 = vadd.f32 %v2501_v29, %v1057_v12 }
 0x1ed   : > { %v1127_v51 = vadd.f32 %v2501_v29, %v1126_v19  ;;  %1150 = vst.msk [vmem:[%s2508_s4 + $0x70] sm:$0xff] %vm1135_vm9, %v1082_v15 }
 0x1ee   : > { %v1105_v41 = vpop.f32.mrf.mxu2  ;;  %1142 = vst.msk [vmem:[%s2508_s4 + $0x30] sm:$0xff] %vm1135_vm9, %v1058_v38 }
 0x1ef   : > { %1165 = vst.msk [vmem:[%s2508_s4 + $0xe8] sm:$0xff] %vm1135_vm9, %v1127_v51  ;;  %v1106_v60 = vadd.f32 %v2501_v29, %v1105_v41 }
 0x1f1   : > { %1158 = vst.msk [vmem:[%s2508_s4 + $0xb0] sm:$0xff] %vm1135_vm9, %v1106_v60 }
 0x1f2   : > { %v1084_v34 = vpop.f32.mrf.mxu1 }
 0x1f3   : > { %v1060_v22 = vpop.f32.mrf.mxu0  ;;  %v1085_v39 = vadd.f32 %v2501_v29, %v1084_v34 }
 0x1f4   : > { %v1129_v55 = vpop.f32.mrf.mxu3  ;;  %v1061_v17 = vadd.f32 %v2501_v29, %v1060_v22 }
 0x1f5   : > { %v1130_v49 = vadd.f32 %v2501_v29, %v1129_v55  ;;  %1151 = vst.msk [vmem:[%s2508_s4 + $0x78] sm:$0xff] %vm1135_vm9, %v1085_v39 }
 0x1f6   : > { %v1108_v40 = vpop.f32.mrf.mxu2  ;;  %1143 = vst.msk [vmem:[%s2508_s4 + $0x38] sm:$0xff] %vm1135_vm9, %v1061_v17 }
 0x1f7   : > { %1166 = vst.msk [vmem:[%s2508_s4 + $0xf0] sm:$0xff] %vm1135_vm9, %v1130_v49  ;;  %v1109_v44 = vadd.f32 %v2501_v29, %v1108_v40 }
 0x1f9   : > { %1159 = vst.msk [vmem:[%s2508_s4 + $0xb8] sm:$0xff] %vm1135_vm9, %v1109_v44 }
 0x1fc   : > { %v1132_v21 = vpop.f32.mrf.mxu3 }
 0x1fd   : > { %v1133_v26 = vadd.f32 %v2501_v29, %v1132_v21 }
 0x1ff   : > { %1167 = vst.msk [vmem:[%s2508_s4 + $0xf8] sm:$0xff] %vm1135_vm9, %v1133_v26 }
 0x200 PF: > { %s13_s12 = sadd.s32 1, %s1361_s12  }
 0x201   : > { %p10_p4 = scmp.ge.s32.totalorder %s13_s12, 4  }
 0x203   :  { %12 = sbr.rel (!%p10_p4) target bundleno = 1 (0x1), region = 62 }

</bundles_post_ra>
